<compile_context>
chip_gen: v7x
topology: tpu7x:2x2x1
jax: 0.10.0
libtpu: 0.0.40
codegen_flags: <defaults>
</compile_context>

<pallas_src>
import functools

import jax
import jax.numpy as jnp
from jax import lax
from jax.experimental import pallas as pl
from jax.experimental.pallas import tpu as pltpu

NEG = -1e30  # large-negative pad for CRF start/end/transitions

_MIB = 1024 * 1024
# Explicit per-stage scoped-VMEM budgets: above the 16/32 MiB defaults, below
# v7x's 64 MiB physical VMEM, and sized for the default tiles chosen below.
_VMEM_PROJ = 32 * _MIB
_VMEM_LSTM = 32 * _MIB
_VMEM_VITERBI = 32 * _MIB


def _round_up(x, m):
    return (x + m - 1) // m * m


def _pick_batch_tile(Bp, max_tile=128):
    """Largest power-of-2 multiple of 8 that divides Bp (Bp is a mult. of 8)."""
    t = 8
    while t * 2 <= min(Bp, max_tile) and Bp % (t * 2) == 0:
        t *= 2
    return t


def _pick_time_chunk(T, max_chunk=32):
    """Largest divisor of T that is <= max_chunk."""
    if T <= max_chunk:
        return T
    for c in range(max_chunk, 0, -1):
        if T % c == 0:
            return c
    return T


def _pick_row_tile(R, max_tile=512):
    """Row tile for the input projection; avoid padding when possible."""
    if R <= max_tile:
        return R, R
    t = max_tile - (max_tile % 8)
    while t >= 8:
        if R % t == 0:
            return t, R
        t -= 8
    return max_tile, _round_up(R, max_tile)   # rare fallback: pad rows


def _sigmoid(x):
    # One EUP push (tanh) instead of exp + reciprocal.
    return 0.5 * jnp.tanh(0.5 * x) + 0.5


# ------------------- stage 1: hoisted input projection (both dirs) -----------
def _matmul_bias_kernel(x_ref, w_ref, b_ref, o_ref):
    acc = jnp.dot(x_ref[...], w_ref[...], preferred_element_type=jnp.float32)
    o_ref[...] = (acc + b_ref[...]).astype(o_ref.dtype)


def matmul_bias(x, w, b, out_dtype):
    """(R, E) @ (E, N) + (1, N) with a row-tiled 'parallel' grid."""
    R, E = x.shape
    N = w.shape[1]
    rt, Rp = _pick_row_tile(R)
    if Rp != R:
        x = jnp.pad(x, ((0, Rp - R), (0, 0)))   # rare: extra HBM copy
    out = pl.pallas_call(
        _matmul_bias_kernel,
        out_shape=jax.ShapeDtypeStruct((Rp, N), out_dtype),
        grid=(Rp // rt,),
        in_specs=[pl.BlockSpec((rt, E), lambda i: (i, 0)),
                  pl.BlockSpec((E, N), lambda i: (0, 0)),
                  pl.BlockSpec((1, N), lambda i: (0, 0))],
        out_specs=pl.BlockSpec((rt, N), lambda i: (i, 0)),
        compiler_params=pltpu.CompilerParams(
            dimension_semantics=("parallel",),
            vmem_limit_bytes=_VMEM_PROJ),
    )(x, w, b)
    return out[:R] if Rp != R else out


# ------------- stage 2: time-chunked LSTM cell fused with hidden2tag ---------
def lstm_emit_kernel(gx_ref, whh_ref, wem_ref, b_ref, out_ref, h_scr, c_scr, hbuf):
    # gx_ref:  (Tc, Bt, 4*Hp) precomputed x @ W_ih^T + (b_ih + b_hh), this
    #          direction / time chunk (chunk index already reversed for d == 1)
    # whh_ref: (Hp, 4*Hp)     this direction's W_hh^T (gate-padded, lane-aligned)
    # wem_ref: (Hp, Kp)       this direction's half of hidden2tag^T (zero-padded)
    # b_ref:   (1, Kp)        hidden2tag bias (folded into the d == 0 partial)
    # out_ref: (Tc, Bt, Kp)   partial emissions for this direction / chunk
    # h_scr/c_scr: (Bt, Hp)   recurrent state, carried across time chunks
    # hbuf:    (Tc*Bt, Hp)    chunk's hidden states for one batched emission dot
    Tc, Bt, _ = gx_ref.shape
    Hp = h_scr.shape[1]
    d = pl.program_id(1)          # 0 = forward, 1 = backward
    k = pl.program_id(2)          # time-chunk index within this direction

    @pl.when(k == 0)              # new (batch tile, direction): reset the state
    def _():
        h_scr[...] = jnp.zeros_like(h_scr)
        c_scr[...] = jnp.zeros_like(c_scr)

    whh = whh_ref[...]
    cdt = whh.dtype

    def step(s, carry):
        t = s + d * (Tc - 1 - 2 * s)          # forward: s; backward: Tc-1-s
        gates = gx_ref[t].astype(jnp.float32) + jnp.dot(
            h_scr[...].astype(cdt), whh, preferred_element_type=jnp.float32)
        # PyTorch gate order i, f, g, o; each gate slice is 128-lane aligned.
        i_g = _sigmoid(gates[:, 0 * Hp:1 * Hp])
        f_g = _sigmoid(gates[:, 1 * Hp:2 * Hp])
        g_g = jnp.tanh(gates[:, 2 * Hp:3 * Hp])
        o_g = _sigmoid(gates[:, 3 * Hp:4 * Hp])
        c_new = f_g * c_scr[...] + i_g * g_g
        h_new = o_g * jnp.tanh(c_new)
        c_scr[...] = c_new
        h_scr[...] = h_new
        row = pl.multiple_of(t * Bt, Bt)
        hbuf[pl.ds(row, Bt), :] = h_new.astype(cdt)
        return carry

    lax.fori_loop(0, Tc, step, 0)

    # One batched hidden2tag matmul per chunk (off the recurrence critical path).
    em = jnp.dot(hbuf[...], wem_ref[...], preferred_element_type=jnp.float32)
    bias_row = b_ref[...] * (d == 0).astype(jnp.float32)   # bias only in fwd part
    for tt in range(Tc):                                    # static, sublane-aligned
        out_ref[tt] = em[tt * Bt:(tt + 1) * Bt, :] + bias_row


# ------------------------------ stage 3: CRF Viterbi --------------------------
def viterbi_kernel(K, parts_ref, trans_ref, start_ref, end_ref, tags_ref, hist_scr):
    # parts_ref: (2, T, Bv, Kp) partial emissions; emissions = parts[0]+parts[1]
    # trans_ref: (K8, Kp) rows = next tag (only the K real rows are used),
    #            cols = prev tag; padded prev cols carry NEG
    # start/end: (1, Kp) with NEG on padded tags
    # tags_ref:  (Bv, Tp) int32, lane-dense decoded tags (time on lanes)
    # hist_scr:  (T, Bv, Kp) int32 backpointers
    _, T, Bv, Kp = parts_ref.shape
    Tp = tags_ref.shape[1]
    trans = trans_ref[...]
    lane_k = lax.broadcasted_iota(jnp.int32, (Bv, Kp), 1)
    lane_t = lax.broadcasted_iota(jnp.int32, (Bv, Tp), 1)

    score0 = start_ref[...] + parts_ref[0, 0] + parts_ref[1, 0]       # (Bv, Kp)

    def fwd(t, score):
        # max-plus step, unrolled over the (small) real tag set so no
        # (Bv, Kp, Kp) intermediate is ever materialized.
        new_score = jnp.full((Bv, Kp), NEG, jnp.float32)
        bp = jnp.zeros((Bv, Kp), jnp.int32)
        for n in range(K):
            cand = score + trans[n:n + 1, :]                           # (Bv, Kp)
            m = jnp.max(cand, axis=-1, keepdims=True)                  # (Bv, 1)
            a = jnp.argmax(cand, axis=-1).astype(jnp.int32)[:, None]   # (Bv, 1)
            sel = lane_k == n
            new_score = jnp.where(sel, m, new_score)
            bp = jnp.where(sel, a, bp)
        hist_scr[t] = bp
        return new_score + parts_ref[0, t] + parts_ref[1, t]

    score = lax.fori_loop(1, T, fwd, score0)
    score = score + end_ref[...]
    best = jnp.argmax(score, axis=-1).astype(jnp.int32)[:, None]       # (Bv, 1)
    tags0 = jnp.where(lane_t == T - 1, best, 0)                        # (Bv, Tp)

    def back(s, carry):                                                # O(T) backtrace
        tags, cur = carry
        t = T - 1 - s
        bp_t = hist_scr[t]                                             # (Bv, Kp)
        prev = jnp.sum(jnp.where(lane_k == cur, bp_t, 0),
                       axis=-1, keepdims=True)                         # (Bv, 1)
        tags = jnp.where(lane_t == t - 1, prev, tags)
        return tags, prev

    tags, _ = lax.fori_loop(0, T - 1, back, (tags0, best))
    tags_ref[...] = tags


# --------------------------------- full forward ------------------------------
def bilstm_crf_forward(sentences, params, *, compute_dtype=jnp.bfloat16,
                       lstm_batch_tile=128, time_chunk=32):
    B, T = sentences.shape
    E = params["embedding"].shape[1]
    Hh = params["w_hh_f"].shape[1]
    K = params["crf_trans"].shape[0]
    Hp = _round_up(Hh, 128)      # lane-aligned hidden width
    Kp = _round_up(K, 128)       # lane-dense tag width
    Tp = _round_up(T, 128)       # lane-dense tag-output time width
    K8 = _round_up(K, 8)
    Bp = _round_up(B, 8)         # batch padded so every tile is 8-aligned
    Bt = _pick_batch_tile(Bp, lstm_batch_tile)   # LSTM batch tile (MXU M dim)
    nb = Bp // Bt
    Bv = 8                       # Viterbi batch tile (decoupled, VPU/XLU bound)
    Tc = _pick_time_chunk(T, time_chunk)
    nT = T // Tc
    cdtype = jnp.dtype(compute_dtype)

    # ---- repack / pad weights (zero pad for linear parts, NEG for CRF) ------
    def gate_pad_cols(w_t):      # (rows, 4*Hh) -> (rows, 4*Hp), gate g at g*Hp
        return jnp.concatenate(
            [jnp.pad(w_t[:, g * Hh:(g + 1) * Hh], ((0, 0), (0, Hp - Hh)))
             for g in range(4)], axis=1)

    def in_proj(w_ih, b_ih, b_hh):
        w_t = gate_pad_cols(jnp.transpose(w_ih))                      # (E, 4*Hp)
        b = gate_pad_cols((b_ih + b_hh).reshape(1, 4 * Hh))           # (1, 4*Hp)
        return w_t, b

    wf, bf = in_proj(params["w_ih_f"], params["b_ih_f"], params["b_hh_f"])
    wb, bb = in_proj(params["w_ih_b"], params["b_ih_b"], params["b_hh_b"])
    w_in_all = jnp.concatenate([wf, wb], axis=1).astype(cdtype)       # (E, 8*Hp)
    b_in_all = jnp.concatenate([bf, bb], axis=1)                      # (1, 8*Hp) f32

    def hh_pad(w_hh):
        w_t = gate_pad_cols(jnp.transpose(w_hh))                      # (Hh, 4*Hp)
        return jnp.pad(w_t, ((0, Hp - Hh), (0, 0)))                   # (Hp, 4*Hp)

    whh_all = jnp.stack([hh_pad(params["w_hh_f"]),
                         hh_pad(params["w_hh_b"])]).astype(cdtype)    # (2, Hp, 4Hp)

    h2t_w = params["h2t_w"]                                           # (K, 2*Hh)
    wem_f = jnp.pad(jnp.transpose(h2t_w[:, :Hh]), ((0, Hp - Hh), (0, Kp - K)))
    wem_b = jnp.pad(jnp.transpose(h2t_w[:, Hh:]), ((0, Hp - Hh), (0, Kp - K)))
    wem_all = jnp.stack([wem_f, wem_b]).astype(cdtype)                # (2, Hp, Kp)

    h2t_b = jnp.pad(params["h2t_b"], (0, Kp - K)).reshape(1, Kp)
    start = jnp.pad(params["crf_start"], (0, Kp - K),
                    constant_values=NEG).reshape(1, Kp)
    end = jnp.pad(params["crf_end"], (0, Kp - K),
                  constant_values=NEG).reshape(1, Kp)
    # trans_rows[next, prev] = trans[prev, next]; only the K real rows are used.
    trans_rows = jnp.pad(jnp.transpose(params["crf_trans"]),
                         ((0, K8 - K), (0, Kp - K)), constant_values=NEG)

    # ---- embedding lookup directly in (T, B) order, batch padded to Bp ------
    emb_tbe = jnp.take(params["embedding"], jnp.transpose(sentences), axis=0)
    emb_tbe = jnp.pad(emb_tbe.astype(cdtype), ((0, 0), (0, Bp - B), (0, 0)))
    x_flat = emb_tbe.reshape(T * Bp, E)

    # ---- stage 1: one MXU matmul for both directions' input projection ------
    gx = matmul_bias(x_flat, w_in_all, b_in_all, cdtype).reshape(T, Bp, 8 * Hp)

    # ---- stage 2: time-chunked recurrence + chunk-batched hidden2tag ---------
    # grid = (batch tile, direction, time chunk); h/c scratch carried across the
    # inner 'arbitrary' time axis; backward-direction chunk order is reversed in
    # the index_map (block index = nT-1-k when d == 1).
    parts = pl.pallas_call(
        lstm_emit_kernel,
        out_shape=jax.ShapeDtypeStruct((2, T, Bp, Kp), jnp.float32),
        grid=(nb, 2, nT),
        in_specs=[
            pl.BlockSpec((Tc, Bt, 4 * Hp),
                         lambda j, d, k: (k + d * (nT - 1 - 2 * k), j, d)),
            pl.BlockSpec((None, Hp, 4 * Hp), lambda j, d, k: (d, 0, 0)),
            pl.BlockSpec((None, Hp, Kp), lambda j, d, k: (d, 0, 0)),
            pl.BlockSpec((1, Kp), lambda j, d, k: (0, 0)),
        ],
        out_specs=pl.BlockSpec(
            (None, Tc, Bt, Kp),
            lambda j, d, k: (d, k + d * (nT - 1 - 2 * k), j, 0)),
        scratch_shapes=[pltpu.VMEM((Bt, Hp), jnp.float32),
                        pltpu.VMEM((Bt, Hp), jnp.float32),
                        pltpu.VMEM((Tc * Bt, Hp), cdtype)],
        compiler_params=pltpu.CompilerParams(
            dimension_semantics=("parallel", "parallel", "arbitrary"),
            vmem_limit_bytes=_VMEM_LSTM),
    )(gx, whh_all, wem_all, h2t_b)
    # TODO(synk): on single-TensorCore chips the two direction partials could be
    # accumulated into one emissions tensor to halve this HBM stream, but that
    # conflicts with per-direction time-chunk ordering; kept as two partials.

    # ---- stage 3: CRF Viterbi decode, small dedicated batch tile -------------
    tags_full = pl.pallas_call(
        functools.partial(viterbi_kernel, K),
        out_shape=jax.ShapeDtypeStruct((Bp, Tp), jnp.int32),
        grid=(Bp // Bv,),
        in_specs=[
            pl.BlockSpec((2, T, Bv, Kp), lambda j: (0, 0, j, 0)),
            pl.BlockSpec((K8, Kp), lambda j: (0, 0)),
            pl.BlockSpec((1, Kp), lambda j: (0, 0)),
            pl.BlockSpec((1, Kp), lambda j: (0, 0)),
        ],
        out_specs=pl.BlockSpec((Bv, Tp), lambda j: (j, 0)),
        scratch_shapes=[pltpu.VMEM((T, Bv, Kp), jnp.int32)],
        compiler_params=pltpu.CompilerParams(
            dimension_semantics=("parallel",),
            vmem_limit_bytes=_VMEM_VITERBI),
    )(parts, trans_rows, start, end)

    return tags_full[:B, :T]   # (B, T) int32 best tag sequences
    # TODO(synk): mask=True path (pack_padded_sequence) not implemented; PyTorch
    # crf.decode returns a Python list of lists — here it's an int32 array.


# ----------------------------- pure-JAX reference ----------------------------
def _reference_forward(sentences, params):
    emb = jnp.take(params["embedding"], sentences, axis=0).astype(jnp.float32)
    Hh = params["w_hh_f"].shape[1]

    def run(x_bte, w_ih, w_hh, b):
        def cell(carry, x_t):
            h, c = carry
            gates = x_t @ w_ih.T + h @ w_hh.T + b
            i, f, g, o = jnp.split(gates, 4, axis=-1)
            i = jax.nn.sigmoid(i); f = jax.nn.sigmoid(f)
            g = jnp.tanh(g); o = jax.nn.sigmoid(o)
            c = f * c + i * g
            h = o * jnp.tanh(c)
            return (h, c), h
        Bsz = x_bte.shape[0]
        init = (jnp.zeros((Bsz, Hh), jnp.float32), jnp.zeros((Bsz, Hh), jnp.float32))
        _, hs = lax.scan(cell, init, jnp.swapaxes(x_bte, 0, 1))
        return jnp.swapaxes(hs, 0, 1)

    hf = run(emb, params["w_ih_f"], params["w_hh_f"],
             params["b_ih_f"] + params["b_hh_f"])
    hb = run(emb[:, ::-1], params["w_ih_b"], params["w_hh_b"],
             params["b_ih_b"] + params["b_hh_b"])[:, ::-1]
    feats = jnp.concatenate([hf, hb], -1) @ params["h2t_w"].T + params["h2t_b"]

    trans, start, end = params["crf_trans"], params["crf_start"], params["crf_end"]

    def decode_one(em):                                   # em: (T, K)
        score = start + em[0]

        def f(sc, e):
            ns = sc[:, None] + trans                      # (prev, next)
            return jnp.max(ns, 0) + e, jnp.argmax(ns, 0)

        score, hist = lax.scan(f, score, em[1:])
        score = score + end
        last = jnp.argmax(score)

        def b(tag, idx_row):
            prev = idx_row[tag]
            return prev, prev

        _, prevs = lax.scan(b, last, hist[::-1])
        return jnp.concatenate([prevs[::-1], last[None]])

    return feats, jax.vmap(decode_one)(feats)


def _paths_score(feats, paths, trans, start, end):
    em_sc = jnp.take_along_axis(feats, paths[..., None], axis=2)[..., 0].sum(1)
    tr_sc = trans[paths[:, :-1], paths[:, 1:]].sum(1)
    return start[paths[:, 0]] + em_sc + tr_sc + end[paths[:, -1]]


def init_params(key, vocab_size, E, H, K):
    Hh = H // 2
    keys = jax.random.split(key, 14)

    def u(k, shape, s=0.1):
        return jax.random.uniform(k, shape, jnp.float32, -s, s)

    return dict(
        embedding=u(keys[0], (vocab_size, E), 1.0),
        w_ih_f=u(keys[1], (4 * Hh, E)),
        w_hh_f=u(keys[2], (4 * Hh, Hh)),
        b_ih_f=u(keys[3], (4 * Hh,)),
        b_hh_f=u(keys[4], (4 * Hh,)),
        w_ih_b=u(keys[5], (4 * Hh, E)),
        w_hh_b=u(keys[6], (4 * Hh, Hh)),
        b_ih_b=u(keys[7], (4 * Hh,)),
        b_hh_b=u(keys[8], (4 * Hh,)),
        h2t_w=u(keys[9], (K, H)),
        h2t_b=u(keys[10], (K,)),
        crf_start=u(keys[11], (K,)),
        crf_end=u(keys[12], (K,)),
        crf_trans=u(keys[13], (K, K)),
    )


if __name__ == "__main__":
    vocab_size, E, H, K = 50, 32, 32, 5   # embedding_dim=32, hidden_dim=32, 5 tags
    B, T = 2, 8
    key = jax.random.PRNGKey(0)
    kp, ks = jax.random.split(key)
    params = init_params(kp, vocab_size, E, H, K)
    sentences = jax.random.randint(ks, (B, T), 0, vocab_size, dtype=jnp.int32)

    # Pure-JAX reference (feats + optimal Viterbi paths) and its path score.
    feats_ref, tags_ref = _reference_forward(sentences, params)
    s_ref = _paths_score(feats_ref, tags_ref.astype(jnp.int32),
                         params["crf_trans"], params["crf_start"],
                         params["crf_end"])

    # f32 mode: decoded path must achieve the optimal Viterbi score exactly.
    fwd_f32 = jax.jit(functools.partial(bilstm_crf_forward,
                                        compute_dtype=jnp.float32))
    tags_f32 = jax.block_until_ready(fwd_f32(sentences, params))
    assert tags_f32.shape == (B, T) and tags_f32.dtype == jnp.int32
    assert bool(jnp.all((tags_f32 >= 0) & (tags_f32 < K)))
    s_f32 = _paths_score(feats_ref, tags_f32, params["crf_trans"],
                         params["crf_start"], params["crf_end"])
    assert bool(jnp.allclose(s_f32, s_ref, atol=1e-3)), "f32 Viterbi score mismatch"

    # bf16 mode (default / fast path): decoded path must be (near-)optimal.
    fwd_bf16 = jax.jit(bilstm_crf_forward)
    tags_bf16 = jax.block_until_ready(fwd_bf16(sentences, params))
    assert tags_bf16.shape == (B, T) and tags_bf16.dtype == jnp.int32
    assert bool(jnp.all((tags_bf16 >= 0) & (tags_bf16 < K)))
    s_bf16 = _paths_score(feats_ref, tags_bf16, params["crf_trans"],
                          params["crf_start"], params["crf_end"])
    assert bool(jnp.all(s_bf16 <= s_ref + 1e-3)), "bf16 path beats the optimum"
    assert bool(jnp.all(s_bf16 >= s_ref - 0.15)), "bf16 path far from optimal"

    print("KERNEL_OK")
</pallas_src>

<mosaic_0001>
module attributes {stable_mosaic.version = 11 : i64} {
  func.func @lstm_emit_kernel(%arg0: i32, %arg1: i32, %arg2: i32, %arg3: memref<8x8x512xf32, #tpu.memory_space<vmem>>, %arg4: memref<1x128x512xf32, #tpu.memory_space<vmem>>, %arg5: memref<1x128x128xf32, #tpu.memory_space<vmem>>, %arg6: memref<1x128xf32, #tpu.memory_space<vmem>>, %arg7: memref<1x8x8x128xf32, #tpu.memory_space<vmem>>, %arg8: memref<8x128xf32, #tpu.memory_space<vmem>>, %arg9: memref<8x128xf32, #tpu.memory_space<vmem>>, %arg10: memref<64x128xf32, #tpu.memory_space<vmem>>) attributes {dimension_semantics = [#tpu.dimension_semantics<parallel>, #tpu.dimension_semantics<parallel>, #tpu.dimension_semantics<arbitrary>], iteration_bounds = array<i64: 1, 2, 1>, scalar_prefetch = 0 : i64, scratch_operands = 3 : i64, tpu.core_type = #tpu.core_type<tc>, window_params = [{transform_indices = @transform_0, window_bounds = array<i64: 8, 8, 512>}, {transform_indices = @transform_1, window_bounds = array<i64: 1, 128, 512>}, {transform_indices = @transform_2, window_bounds = array<i64: 1, 128, 128>}, {pipeline_mode = #tpu.pipeline_mode<synchronous>, transform_indices = @transform_3, window_bounds = array<i64: 1, 128>}, {transform_indices = @transform_4, window_bounds = array<i64: 1, 8, 8, 128>}]} {
    %c0_i32 = arith.constant 0 : i32
    %0 = arith.cmpi eq, %arg2, %c0_i32 : i32
    %1 = arith.extui %0 : i1 to i32
    %c0_i32_0 = arith.constant 0 : i32
    %2 = arith.cmpi ne, %1, %c0_i32_0 : i32
    scf.if %2 {
      %cst_38 = arith.constant 0.000000e+00 : f32
      %64 = vector.broadcast %cst_38 : f32 to vector<8x128xf32>
      %c0_39 = arith.constant 0 : index
      %c0_40 = arith.constant 0 : index
      %65 = vector.load %arg8[%c0_39, %c0_40] : memref<8x128xf32, #tpu.memory_space<vmem>>, vector<8x128xf32>
      tpu.vector_store %arg8[%c0_39, %c0_40], %64 {strides = array<i32>} : memref<8x128xf32, #tpu.memory_space<vmem>>, vector<8x128xf32>,
      %cst_41 = arith.constant 0.000000e+00 : f32
      %66 = vector.broadcast %cst_41 : f32 to vector<8x128xf32>
      %c0_42 = arith.constant 0 : index
      %c0_43 = arith.constant 0 : index
      %67 = vector.load %arg9[%c0_42, %c0_43] : memref<8x128xf32, #tpu.memory_space<vmem>>, vector<8x128xf32>
      tpu.vector_store %arg9[%c0_42, %c0_43], %66 {strides = array<i32>} : memref<8x128xf32, #tpu.memory_space<vmem>>, vector<8x128xf32>,
    } else {
    }
    %c0 = arith.constant 0 : index
    %c0_1 = arith.constant 0 : index
    %c0_2 = arith.constant 0 : index
    %3 = vector.load %arg4[%c0, %c0_1, %c0_2] : memref<1x128x512xf32, #tpu.memory_space<vmem>>, vector<1x128x512xf32>
    %4 = vector.shape_cast %3 : vector<1x128x512xf32> to vector<128x512xf32>
    %c0_i32_3 = arith.constant 0 : i32
    %c8_i32 = arith.constant 8 : i32
    %5 = arith.addi %c0_i32_3, %c8_i32 : i32
    %c1_i32 = arith.constant 1 : i32
    scf.for %arg11 = %c0_i32_3 to %5 step %c1_i32  : i32 {
      %c2_i32 = arith.constant 2 : i32
      %64 = arith.muli %c2_i32, %arg11 : i32
      %c7_i32 = arith.constant 7 : i32
      %65 = arith.subi %c7_i32, %64 : i32
      %66 = arith.muli %arg1, %65 : i32
      %67 = arith.addi %arg11, %66 : i32
      %68 = arith.index_cast %67 : i32 to index
      %c0_38 = arith.constant 0 : index
      %c0_39 = arith.constant 0 : index
      %69 = vector.load %arg3[%68, %c0_38, %c0_39] : memref<8x8x512xf32, #tpu.memory_space<vmem>>, vector<1x8x512xf32>
      %70 = vector.shape_cast %69 : vector<1x8x512xf32> to vector<8x512xf32>
      %c0_40 = arith.constant 0 : index
      %c0_41 = arith.constant 0 : index
      %71 = vector.load %arg8[%c0_40, %c0_41] : memref<8x128xf32, #tpu.memory_space<vmem>>, vector<8x128xf32>
      %cst_42 = arith.constant dense<0.000000e+00> : vector<8x512xf32>
      %72 = tpu.matmul %71, %4, %cst_42 {dimension_numbers = #tpu.dot_dimension_numbers<[1], [0], [0], [1], [0, 0, 1, 1], [], []>} : vector<8x128xf32>, vector<128x512xf32>, vector<8x512xf32> -> vector<8x512xf32>
      %73 = arith.addf %70, %72 : vector<8x512xf32>
      %74 = vector.extract_strided_slice %73 {offsets = [0, 0], sizes = [8, 128], strides = [1, 1]} : vector<8x512xf32> to vector<8x128xf32>
      %cst_43 = arith.constant 5.000000e-01 : f32
      %75 = vector.broadcast %cst_43 : f32 to vector<8x128xf32>
      %76 = arith.mulf %75, %74 : vector<8x128xf32>
      %77 = math.tanh %76 : vector<8x128xf32>
      %cst_44 = arith.constant 5.000000e-01 : f32
      %78 = vector.broadcast %cst_44 : f32 to vector<8x128xf32>
      %79 = arith.mulf %78, %77 : vector<8x128xf32>
      %cst_45 = arith.constant 5.000000e-01 : f32
      %80 = vector.broadcast %cst_45 : f32 to vector<8x128xf32>
      %81 = arith.addf %79, %80 : vector<8x128xf32>
      %82 = vector.extract_strided_slice %73 {offsets = [0, 128], sizes = [8, 128], strides = [1, 1]} : vector<8x512xf32> to vector<8x128xf32>
      %cst_46 = arith.constant 5.000000e-01 : f32
      %83 = vector.broadcast %cst_46 : f32 to vector<8x128xf32>
      %84 = arith.mulf %83, %82 : vector<8x128xf32>
      %85 = math.tanh %84 : vector<8x128xf32>
      %cst_47 = arith.constant 5.000000e-01 : f32
      %86 = vector.broadcast %cst_47 : f32 to vector<8x128xf32>
      %87 = arith.mulf %86, %85 : vector<8x128xf32>
      %cst_48 = arith.constant 5.000000e-01 : f32
      %88 = vector.broadcast %cst_48 : f32 to vector<8x128xf32>
      %89 = arith.addf %87, %88 : vector<8x128xf32>
      %90 = vector.extract_strided_slice %73 {offsets = [0, 256], sizes = [8, 128], strides = [1, 1]} : vector<8x512xf32> to vector<8x128xf32>
      %91 = math.tanh %90 : vector<8x128xf32>
      %92 = vector.extract_strided_slice %73 {offsets = [0, 384], sizes = [8, 128], strides = [1, 1]} : vector<8x512xf32> to vector<8x128xf32>
      %cst_49 = arith.constant 5.000000e-01 : f32
      %93 = vector.broadcast %cst_49 : f32 to vector<8x128xf32>
      %94 = arith.mulf %93, %92 : vector<8x128xf32>
      %95 = math.tanh %94 : vector<8x128xf32>
      %cst_50 = arith.constant 5.000000e-01 : f32
      %96 = vector.broadcast %cst_50 : f32 to vector<8x128xf32>
      %97 = arith.mulf %96, %95 : vector<8x128xf32>
      %cst_51 = arith.constant 5.000000e-01 : f32
      %98 = vector.broadcast %cst_51 : f32 to vector<8x128xf32>
      %99 = arith.addf %97, %98 : vector<8x128xf32>
      %c0_52 = arith.constant 0 : index
      %c0_53 = arith.constant 0 : index
      %100 = vector.load %arg9[%c0_52, %c0_53] : memref<8x128xf32, #tpu.memory_space<vmem>>, vector<8x128xf32>
      %101 = arith.mulf %89, %100 : vector<8x128xf32>
      %102 = arith.mulf %81, %91 : vector<8x128xf32>
      %103 = arith.addf %101, %102 : vector<8x128xf32>
      %104 = math.tanh %103 : vector<8x128xf32>
      %105 = arith.mulf %99, %104 : vector<8x128xf32>
      %c0_54 = arith.constant 0 : index
      %c0_55 = arith.constant 0 : index
      %106 = vector.load %arg9[%c0_54, %c0_55] : memref<8x128xf32, #tpu.memory_space<vmem>>, vector<8x128xf32>
      tpu.vector_store %arg9[%c0_54, %c0_55], %103 {strides = array<i32>} : memref<8x128xf32, #tpu.memory_space<vmem>>, vector<8x128xf32>,
      %c0_56 = arith.constant 0 : index
      %c0_57 = arith.constant 0 : index
      %107 = vector.load %arg8[%c0_56, %c0_57] : memref<8x128xf32, #tpu.memory_space<vmem>>, vector<8x128xf32>
      tpu.vector_store %arg8[%c0_56, %c0_57], %105 {strides = array<i32>} : memref<8x128xf32, #tpu.memory_space<vmem>>, vector<8x128xf32>,
      %c8_i32_58 = arith.constant 8 : i32
      %108 = arith.muli %67, %c8_i32_58 : i32
      %109 = tpu.assume_multiple %108, 8 : i32
      %110 = arith.index_cast %109 : i32 to index
      %c0_59 = arith.constant 0 : index
      %111 = vector.load %arg10[%110, %c0_59] : memref<64x128xf32, #tpu.memory_space<vmem>>, vector<8x128xf32>
      tpu.vector_store %arg10[%110, %c0_59], %105 {strides = array<i32>} : memref<64x128xf32, #tpu.memory_space<vmem>>, vector<8x128xf32>,
    }
    %c8_i32_4 = arith.constant 8 : i32
    %c0_5 = arith.constant 0 : index
    %c0_6 = arith.constant 0 : index
    %6 = vector.load %arg10[%c0_5, %c0_6] : memref<64x128xf32, #tpu.memory_space<vmem>>, vector<64x128xf32>
    %c0_7 = arith.constant 0 : index
    %c0_8 = arith.constant 0 : index
    %c0_9 = arith.constant 0 : index
    %7 = vector.load %arg5[%c0_7, %c0_8, %c0_9] : memref<1x128x128xf32, #tpu.memory_space<vmem>>, vector<1x128x128xf32>
    %8 = vector.shape_cast %7 : vector<1x128x128xf32> to vector<128x128xf32>
    %cst = arith.constant dense<0.000000e+00> : vector<64x128xf32>
    %9 = tpu.matmul %6, %8, %cst {dimension_numbers = #tpu.dot_dimension_numbers<[1], [0], [0], [1], [0, 0, 1, 1], [], []>} : vector<64x128xf32>, vector<128x128xf32>, vector<64x128xf32> -> vector<64x128xf32>
    %c0_10 = arith.constant 0 : index
    %c0_11 = arith.constant 0 : index
    %10 = vector.load %arg6[%c0_10, %c0_11] : memref<1x128xf32, #tpu.memory_space<vmem>>, vector<1x128xf32>
    %c0_i32_12 = arith.constant 0 : i32
    %11 = arith.cmpi eq, %arg1, %c0_i32_12 : i32
    %12 = arith.extui %11 : i1 to i32
    %13 = arith.sitofp %12 : i32 to f32
    %14 = vector.broadcast %13 : f32 to vector<1x128xf32>
    %15 = arith.mulf %10, %14 : vector<1x128xf32>
    %16 = vector.extract_strided_slice %9 {offsets = [0, 0], sizes = [8, 128], strides = [1, 1]} : vector<64x128xf32> to vector<8x128xf32>
    %17 = vector.broadcast %15 : vector<1x128xf32> to vector<8x128xf32>
    %18 = arith.addf %16, %17 : vector<8x128xf32>
    %c0_13 = arith.constant 0 : index
    %c0_14 = arith.constant 0 : index
    %c0_15 = arith.constant 0 : index
    %c0_16 = arith.constant 0 : index
    %19 = vector.load %arg7[%c0_13, %c0_14, %c0_15, %c0_16] : memref<1x8x8x128xf32, #tpu.memory_space<vmem>>, vector<1x1x8x128xf32>
    %20 = vector.shape_cast %19 : vector<1x1x8x128xf32> to vector<8x128xf32>
    %21 = vector.shape_cast %18 : vector<8x128xf32> to vector<1x1x8x128xf32>
    tpu.vector_store %arg7[%c0_13, %c0_14, %c0_15, %c0_16], %21 {strides = array<i32>} : memref<1x8x8x128xf32, #tpu.memory_space<vmem>>, vector<1x1x8x128xf32>,
    %22 = vector.extract_strided_slice %9 {offsets = [8, 0], sizes = [8, 128], strides = [1, 1]} : vector<64x128xf32> to vector<8x128xf32>
    %23 = vector.broadcast %15 : vector<1x128xf32> to vector<8x128xf32>
    %24 = arith.addf %22, %23 : vector<8x128xf32>
    %c0_17 = arith.constant 0 : index
    %c1 = arith.constant 1 : index
    %c0_18 = arith.constant 0 : index
    %c0_19 = arith.constant 0 : index
    %25 = vector.load %arg7[%c0_17, %c1, %c0_18, %c0_19] : memref<1x8x8x128xf32, #tpu.memory_space<vmem>>, vector<1x1x8x128xf32>
    %26 = vector.shape_cast %25 : vector<1x1x8x128xf32> to vector<8x128xf32>
    %27 = vector.shape_cast %24 : vector<8x128xf32> to vector<1x1x8x128xf32>
    tpu.vector_store %arg7[%c0_17, %c1, %c0_18, %c0_19], %27 {strides = array<i32>} : memref<1x8x8x128xf32, #tpu.memory_space<vmem>>, vector<1x1x8x128xf32>,
    %28 = vector.extract_strided_slice %9 {offsets = [16, 0], sizes = [8, 128], strides = [1, 1]} : vector<64x128xf32> to vector<8x128xf32>
    %29 = vector.broadcast %15 : vector<1x128xf32> to vector<8x128xf32>
    %30 = arith.addf %28, %29 : vector<8x128xf32>
    %c0_20 = arith.constant 0 : index
    %c2 = arith.constant 2 : index
    %c0_21 = arith.constant 0 : index
    %c0_22 = arith.constant 0 : index
    %31 = vector.load %arg7[%c0_20, %c2, %c0_21, %c0_22] : memref<1x8x8x128xf32, #tpu.memory_space<vmem>>, vector<1x1x8x128xf32>
    %32 = vector.shape_cast %31 : vector<1x1x8x128xf32> to vector<8x128xf32>
    %33 = vector.shape_cast %30 : vector<8x128xf32> to vector<1x1x8x128xf32>
    tpu.vector_store %arg7[%c0_20, %c2, %c0_21, %c0_22], %33 {strides = array<i32>} : memref<1x8x8x128xf32, #tpu.memory_space<vmem>>, vector<1x1x8x128xf32>,
    %34 = vector.extract_strided_slice %9 {offsets = [24, 0], sizes = [8, 128], strides = [1, 1]} : vector<64x128xf32> to vector<8x128xf32>
    %35 = vector.broadcast %15 : vector<1x128xf32> to vector<8x128xf32>
    %36 = arith.addf %34, %35 : vector<8x128xf32>
    %c0_23 = arith.constant 0 : index
    %c3 = arith.constant 3 : index
    %c0_24 = arith.constant 0 : index
    %c0_25 = arith.constant 0 : index
    %37 = vector.load %arg7[%c0_23, %c3, %c0_24, %c0_25] : memref<1x8x8x128xf32, #tpu.memory_space<vmem>>, vector<1x1x8x128xf32>
    %38 = vector.shape_cast %37 : vector<1x1x8x128xf32> to vector<8x128xf32>
    %39 = vector.shape_cast %36 : vector<8x128xf32> to vector<1x1x8x128xf32>
    tpu.vector_store %arg7[%c0_23, %c3, %c0_24, %c0_25], %39 {strides = array<i32>} : memref<1x8x8x128xf32, #tpu.memory_space<vmem>>, vector<1x1x8x128xf32>,
    %40 = vector.extract_strided_slice %9 {offsets = [32, 0], sizes = [8, 128], strides = [1, 1]} : vector<64x128xf32> to vector<8x128xf32>
    %41 = vector.broadcast %15 : vector<1x128xf32> to vector<8x128xf32>
    %42 = arith.addf %40, %41 : vector<8x128xf32>
    %c0_26 = arith.constant 0 : index
    %c4 = arith.constant 4 : index
    %c0_27 = arith.constant 0 : index
    %c0_28 = arith.constant 0 : index
    %43 = vector.load %arg7[%c0_26, %c4, %c0_27, %c0_28] : memref<1x8x8x128xf32, #tpu.memory_space<vmem>>, vector<1x1x8x128xf32>
    %44 = vector.shape_cast %43 : vector<1x1x8x128xf32> to vector<8x128xf32>
    %45 = vector.shape_cast %42 : vector<8x128xf32> to vector<1x1x8x128xf32>
    tpu.vector_store %arg7[%c0_26, %c4, %c0_27, %c0_28], %45 {strides = array<i32>} : memref<1x8x8x128xf32, #tpu.memory_space<vmem>>, vector<1x1x8x128xf32>,
    %46 = vector.extract_strided_slice %9 {offsets = [40, 0], sizes = [8, 128], strides = [1, 1]} : vector<64x128xf32> to vector<8x128xf32>
    %47 = vector.broadcast %15 : vector<1x128xf32> to vector<8x128xf32>
    %48 = arith.addf %46, %47 : vector<8x128xf32>
    %c0_29 = arith.constant 0 : index
    %c5 = arith.constant 5 : index
    %c0_30 = arith.constant 0 : index
    %c0_31 = arith.constant 0 : index
    %49 = vector.load %arg7[%c0_29, %c5, %c0_30, %c0_31] : memref<1x8x8x128xf32, #tpu.memory_space<vmem>>, vector<1x1x8x128xf32>
    %50 = vector.shape_cast %49 : vector<1x1x8x128xf32> to vector<8x128xf32>
    %51 = vector.shape_cast %48 : vector<8x128xf32> to vector<1x1x8x128xf32>
    tpu.vector_store %arg7[%c0_29, %c5, %c0_30, %c0_31], %51 {strides = array<i32>} : memref<1x8x8x128xf32, #tpu.memory_space<vmem>>, vector<1x1x8x128xf32>,
    %52 = vector.extract_strided_slice %9 {offsets = [48, 0], sizes = [8, 128], strides = [1, 1]} : vector<64x128xf32> to vector<8x128xf32>
    %53 = vector.broadcast %15 : vector<1x128xf32> to vector<8x128xf32>
    %54 = arith.addf %52, %53 : vector<8x128xf32>
    %c0_32 = arith.constant 0 : index
    %c6 = arith.constant 6 : index
    %c0_33 = arith.constant 0 : index
    %c0_34 = arith.constant 0 : index
    %55 = vector.load %arg7[%c0_32, %c6, %c0_33, %c0_34] : memref<1x8x8x128xf32, #tpu.memory_space<vmem>>, vector<1x1x8x128xf32>
    %56 = vector.shape_cast %55 : vector<1x1x8x128xf32> to vector<8x128xf32>
    %57 = vector.shape_cast %54 : vector<8x128xf32> to vector<1x1x8x128xf32>
    tpu.vector_store %arg7[%c0_32, %c6, %c0_33, %c0_34], %57 {strides = array<i32>} : memref<1x8x8x128xf32, #tpu.memory_space<vmem>>, vector<1x1x8x128xf32>,
    %58 = vector.extract_strided_slice %9 {offsets = [56, 0], sizes = [8, 128], strides = [1, 1]} : vector<64x128xf32> to vector<8x128xf32>
    %59 = vector.broadcast %15 : vector<1x128xf32> to vector<8x128xf32>
    %60 = arith.addf %58, %59 : vector<8x128xf32>
    %c0_35 = arith.constant 0 : index
    %c7 = arith.constant 7 : index
    %c0_36 = arith.constant 0 : index
    %c0_37 = arith.constant 0 : index
    %61 = vector.load %arg7[%c0_35, %c7, %c0_36, %c0_37] : memref<1x8x8x128xf32, #tpu.memory_space<vmem>>, vector<1x1x8x128xf32>
    %62 = vector.shape_cast %61 : vector<1x1x8x128xf32> to vector<8x128xf32>
    %63 = vector.shape_cast %60 : vector<8x128xf32> to vector<1x1x8x128xf32>
    tpu.vector_store %arg7[%c0_35, %c7, %c0_36, %c0_37], %63 {strides = array<i32>} : memref<1x8x8x128xf32, #tpu.memory_space<vmem>>, vector<1x1x8x128xf32>,
    return
  }
  func.func @transform_0(%arg0: i32, %arg1: i32, %arg2: i32) -> (i32, i32, i32) {
    %c2_i32 = arith.constant 2 : i32
    %0 = arith.muli %c2_i32, %arg2 : i32
    %c0_i32 = arith.constant 0 : i32
    %1 = arith.subi %c0_i32, %0 : i32
    %2 = arith.muli %arg1, %1 : i32
    %3 = arith.addi %arg2, %2 : i32
    %c0_i32_0 = arith.constant 0 : i32
    return %3, %arg0, %arg1 : i32, i32, i32
  }
  func.func @transform_1(%arg0: i32, %arg1: i32, %arg2: i32) -> (i32, i32, i32) {
    %c0_i32 = arith.constant 0 : i32
    %c0_i32_0 = arith.constant 0 : i32
    %c0_i32_1 = arith.constant 0 : i32
    return %arg1, %c0_i32, %c0_i32_0 : i32, i32, i32
  }
  func.func @transform_2(%arg0: i32, %arg1: i32, %arg2: i32) -> (i32, i32, i32) {
    %c0_i32 = arith.constant 0 : i32
    %c0_i32_0 = arith.constant 0 : i32
    %c0_i32_1 = arith.constant 0 : i32
    return %arg1, %c0_i32, %c0_i32_0 : i32, i32, i32
  }
  func.func @transform_3(%arg0: i32, %arg1: i32, %arg2: i32) -> (i32, i32) {
    %c0_i32 = arith.constant 0 : i32
    %c0_i32_0 = arith.constant 0 : i32
    %c0_i32_1 = arith.constant 0 : i32
    return %c0_i32, %c0_i32_0 : i32, i32
  }
  func.func @transform_4(%arg0: i32, %arg1: i32, %arg2: i32) -> (i32, i32, i32, i32) {
    %c2_i32 = arith.constant 2 : i32
    %0 = arith.muli %c2_i32, %arg2 : i32
    %c0_i32 = arith.constant 0 : i32
    %1 = arith.subi %c0_i32, %0 : i32
    %2 = arith.muli %arg1, %1 : i32
    %3 = arith.addi %arg2, %2 : i32
    %c0_i32_0 = arith.constant 0 : i32
    %c0_i32_1 = arith.constant 0 : i32
    return %arg1, %3, %arg0, %c0_i32_0 : i32, i32, i32, i32
  }
}

module attributes {stable_mosaic.version = 11 : i64} {
  func.func @_matmul_bias_kernel(%arg0: i32, %arg1: memref<64x32xf32, #tpu.memory_space<vmem>>, %arg2: memref<32x1024xf32, #tpu.memory_space<vmem>>, %arg3: memref<1x1024xf32, #tpu.memory_space<vmem>>, %arg4: memref<64x1024xf32, #tpu.memory_space<vmem>>) attributes {dimension_semantics = [#tpu.dimension_semantics<parallel>], iteration_bounds = array<i64: 1>, scalar_prefetch = 0 : i64, scratch_operands = 0 : i64, tpu.core_type = #tpu.core_type<tc>, window_params = [{transform_indices = @transform_0, window_bounds = array<i64: 64, 32>}, {pipeline_mode = #tpu.pipeline_mode<synchronous>, transform_indices = @transform_1, window_bounds = array<i64: 32, 1024>}, {pipeline_mode = #tpu.pipeline_mode<synchronous>, transform_indices = @transform_2, window_bounds = array<i64: 1, 1024>}, {transform_indices = @transform_3, window_bounds = array<i64: 64, 1024>}]} {
    %c0 = arith.constant 0 : index
    %c0_0 = arith.constant 0 : index
    %0 = vector.load %arg1[%c0, %c0_0] : memref<64x32xf32, #tpu.memory_space<vmem>>, vector<64x32xf32>
    %c0_1 = arith.constant 0 : index
    %c0_2 = arith.constant 0 : index
    %1 = vector.load %arg2[%c0_1, %c0_2] : memref<32x1024xf32, #tpu.memory_space<vmem>>, vector<32x1024xf32>
    %cst = arith.constant dense<0.000000e+00> : vector<64x1024xf32>
    %2 = tpu.matmul %0, %1, %cst {dimension_numbers = #tpu.dot_dimension_numbers<[1], [0], [0], [1], [0, 0, 1, 1], [], []>} : vector<64x32xf32>, vector<32x1024xf32>, vector<64x1024xf32> -> vector<64x1024xf32>
    %c0_3 = arith.constant 0 : index
    %c0_4 = arith.constant 0 : index
    %3 = vector.load %arg3[%c0_3, %c0_4] : memref<1x1024xf32, #tpu.memory_space<vmem>>, vector<1x1024xf32>
    %4 = vector.broadcast %3 : vector<1x1024xf32> to vector<64x1024xf32>
    %5 = arith.addf %2, %4 : vector<64x1024xf32>
    %c0_5 = arith.constant 0 : index
    %c0_6 = arith.constant 0 : index
    %6 = vector.load %arg4[%c0_5, %c0_6] : memref<64x1024xf32, #tpu.memory_space<vmem>>, vector<64x1024xf32>
    tpu.vector_store %arg4[%c0_5, %c0_6], %5 {strides = array<i32>} : memref<64x1024xf32, #tpu.memory_space<vmem>>, vector<64x1024xf32>,
    return
  }
  func.func @transform_0(%arg0: i32) -> (i32, i32) {
    %c0_i32 = arith.constant 0 : i32
    %c0_i32_0 = arith.constant 0 : i32
    return %arg0, %c0_i32 : i32, i32
  }
  func.func @transform_1(%arg0: i32) -> (i32, i32) {
    %c0_i32 = arith.constant 0 : i32
    %c0_i32_0 = arith.constant 0 : i32
    %c0_i32_1 = arith.constant 0 : i32
    return %c0_i32, %c0_i32_0 : i32, i32
  }
  func.func @transform_2(%arg0: i32) -> (i32, i32) {
    %c0_i32 = arith.constant 0 : i32
    %c0_i32_0 = arith.constant 0 : i32
    %c0_i32_1 = arith.constant 0 : i32
    return %c0_i32, %c0_i32_0 : i32, i32
  }
  func.func @transform_3(%arg0: i32) -> (i32, i32) {
    %c0_i32 = arith.constant 0 : i32
    %c0_i32_0 = arith.constant 0 : i32
    return %arg0, %c0_i32 : i32, i32
  }
}

module attributes {stable_mosaic.version = 11 : i64} {
  func.func @viterbi_kernel(%arg0: i32, %arg1: memref<2x8x8x128xf32, #tpu.memory_space<vmem>>, %arg2: memref<8x128xf32, #tpu.memory_space<vmem>>, %arg3: memref<1x128xf32, #tpu.memory_space<vmem>>, %arg4: memref<1x128xf32, #tpu.memory_space<vmem>>, %arg5: memref<8x128xi32, #tpu.memory_space<vmem>>, %arg6: memref<8x8x128xi32, #tpu.memory_space<vmem>>) attributes {dimension_semantics = [#tpu.dimension_semantics<parallel>], iteration_bounds = array<i64: 1>, scalar_prefetch = 0 : i64, scratch_operands = 1 : i64, tpu.core_type = #tpu.core_type<tc>, window_params = [{transform_indices = @transform_0, window_bounds = array<i64: 2, 8, 8, 128>}, {pipeline_mode = #tpu.pipeline_mode<synchronous>, transform_indices = @transform_1, window_bounds = array<i64: 8, 128>}, {pipeline_mode = #tpu.pipeline_mode<synchronous>, transform_indices = @transform_2, window_bounds = array<i64: 1, 128>}, {pipeline_mode = #tpu.pipeline_mode<synchronous>, transform_indices = @transform_3, window_bounds = array<i64: 1, 128>}, {transform_indices = @transform_4, window_bounds = array<i64: 8, 128>}]} {
    %c0 = arith.constant 0 : index
    %c0_0 = arith.constant 0 : index
    %0 = vector.load %arg2[%c0, %c0_0] : memref<8x128xf32, #tpu.memory_space<vmem>>, vector<8x128xf32>
    %1 = tpu.iota {dimensions = array<i32: 1>} : vector<8x128xi32>
    %2 = tpu.iota {dimensions = array<i32: 1>} : vector<8x128xi32>
    %c0_1 = arith.constant 0 : index
    %c0_2 = arith.constant 0 : index
    %3 = vector.load %arg3[%c0_1, %c0_2] : memref<1x128xf32, #tpu.memory_space<vmem>>, vector<1x128xf32>
    %c0_3 = arith.constant 0 : index
    %c0_4 = arith.constant 0 : index
    %c0_5 = arith.constant 0 : index
    %c0_6 = arith.constant 0 : index
    %4 = vector.load %arg1[%c0_3, %c0_4, %c0_5, %c0_6] : memref<2x8x8x128xf32, #tpu.memory_space<vmem>>, vector<1x1x8x128xf32>
    %5 = vector.shape_cast %4 : vector<1x1x8x128xf32> to vector<8x128xf32>
    %6 = vector.broadcast %3 : vector<1x128xf32> to vector<8x128xf32>
    %7 = arith.addf %6, %5 : vector<8x128xf32>
    %c1 = arith.constant 1 : index
    %c0_7 = arith.constant 0 : index
    %c0_8 = arith.constant 0 : index
    %c0_9 = arith.constant 0 : index
    %8 = vector.load %arg1[%c1, %c0_7, %c0_8, %c0_9] : memref<2x8x8x128xf32, #tpu.memory_space<vmem>>, vector<1x1x8x128xf32>
    %9 = vector.shape_cast %8 : vector<1x1x8x128xf32> to vector<8x128xf32>
    %10 = arith.addf %7, %9 : vector<8x128xf32>
    %c1_i32 = arith.constant 1 : i32
    %c7_i32 = arith.constant 7 : i32
    %11 = arith.addi %c1_i32, %c7_i32 : i32
    %c1_i32_10 = arith.constant 1 : i32
    %12 = scf.for %arg7 = %c1_i32 to %11 step %c1_i32_10 iter_args(%arg8 = %10) -> (vector<8x128xf32>)  : i32 {
      %cst = arith.constant -1.000000e+30 : f32
      %27 = vector.broadcast %cst : f32 to vector<8x128xf32>
      %c0_i32_21 = arith.constant 0 : i32
      %28 = vector.broadcast %c0_i32_21 : i32 to vector<8x128xi32>
      %29 = vector.extract_strided_slice %0 {offsets = [0, 0], sizes = [1, 128], strides = [1, 1]} : vector<8x128xf32> to vector<1x128xf32>
      %30 = vector.broadcast %29 : vector<1x128xf32> to vector<8x128xf32>
      %31 = arith.addf %arg8, %30 : vector<8x128xf32>
      %cst_22 = arith.constant dense<0xFF800000> : vector<8xf32>
      %32 = vector.multi_reduction <maximumf>, %31, %cst_22 [1] : vector<8x128xf32> to vector<8xf32>
      %33 = vector.shape_cast %32 : vector<8xf32> to vector<8x1xf32>
      %34 = tpu.reduce_index %31 {axis = 1 : i32, kind = #tpu.reduction_kind<arg_max>} : vector<8x128xf32> -> vector<8xi32>
      %35 = vector.shape_cast %34 : vector<8xi32> to vector<8x1xi32>
      %c0_i32_23 = arith.constant 0 : i32
      %36 = vector.broadcast %c0_i32_23 : i32 to vector<8x128xi32>
      %37 = arith.cmpi eq, %1, %36 : vector<8x128xi32>
      %38 = vector.shape_cast %33 : vector<8x1xf32> to vector<8x1xf32>
      %39 = vector.broadcast %38 : vector<8x1xf32> to vector<8x128xf32>
      %40 = arith.select %37, %39, %27 : vector<8x128xi1>, vector<8x128xf32>
      %41 = vector.shape_cast %35 : vector<8x1xi32> to vector<8x1xi32>
      %42 = vector.broadcast %41 : vector<8x1xi32> to vector<8x128xi32>
      %43 = arith.select %37, %42, %28 : vector<8x128xi1>, vector<8x128xi32>
      %44 = vector.extract_strided_slice %0 {offsets = [1, 0], sizes = [1, 128], strides = [1, 1]} : vector<8x128xf32> to vector<1x128xf32>
      %45 = vector.broadcast %44 : vector<1x128xf32> to vector<8x128xf32>
      %46 = arith.addf %arg8, %45 : vector<8x128xf32>
      %cst_24 = arith.constant dense<0xFF800000> : vector<8xf32>
      %47 = vector.multi_reduction <maximumf>, %46, %cst_24 [1] : vector<8x128xf32> to vector<8xf32>
      %48 = vector.shape_cast %47 : vector<8xf32> to vector<8x1xf32>
      %49 = tpu.reduce_index %46 {axis = 1 : i32, kind = #tpu.reduction_kind<arg_max>} : vector<8x128xf32> -> vector<8xi32>
      %50 = vector.shape_cast %49 : vector<8xi32> to vector<8x1xi32>
      %c1_i32_25 = arith.constant 1 : i32
      %51 = vector.broadcast %c1_i32_25 : i32 to vector<8x128xi32>
      %52 = arith.cmpi eq, %1, %51 : vector<8x128xi32>
      %53 = vector.shape_cast %48 : vector<8x1xf32> to vector<8x1xf32>
      %54 = vector.broadcast %53 : vector<8x1xf32> to vector<8x128xf32>
      %55 = arith.select %52, %54, %40 : vector<8x128xi1>, vector<8x128xf32>
      %56 = vector.shape_cast %50 : vector<8x1xi32> to vector<8x1xi32>
      %57 = vector.broadcast %56 : vector<8x1xi32> to vector<8x128xi32>
      %58 = arith.select %52, %57, %43 : vector<8x128xi1>, vector<8x128xi32>
      %59 = vector.extract_strided_slice %0 {offsets = [2, 0], sizes = [1, 128], strides = [1, 1]} : vector<8x128xf32> to vector<1x128xf32>
      %60 = vector.broadcast %59 : vector<1x128xf32> to vector<8x128xf32>
      %61 = arith.addf %arg8, %60 : vector<8x128xf32>
      %cst_26 = arith.constant dense<0xFF800000> : vector<8xf32>
      %62 = vector.multi_reduction <maximumf>, %61, %cst_26 [1] : vector<8x128xf32> to vector<8xf32>
      %63 = vector.shape_cast %62 : vector<8xf32> to vector<8x1xf32>
      %64 = tpu.reduce_index %61 {axis = 1 : i32, kind = #tpu.reduction_kind<arg_max>} : vector<8x128xf32> -> vector<8xi32>
      %65 = vector.shape_cast %64 : vector<8xi32> to vector<8x1xi32>
      %c2_i32 = arith.constant 2 : i32
      %66 = vector.broadcast %c2_i32 : i32 to vector<8x128xi32>
      %67 = arith.cmpi eq, %1, %66 : vector<8x128xi32>
      %68 = vector.shape_cast %63 : vector<8x1xf32> to vector<8x1xf32>
      %69 = vector.broadcast %68 : vector<8x1xf32> to vector<8x128xf32>
      %70 = arith.select %67, %69, %55 : vector<8x128xi1>, vector<8x128xf32>
      %71 = vector.shape_cast %65 : vector<8x1xi32> to vector<8x1xi32>
      %72 = vector.broadcast %71 : vector<8x1xi32> to vector<8x128xi32>
      %73 = arith.select %67, %72, %58 : vector<8x128xi1>, vector<8x128xi32>
      %74 = vector.extract_strided_slice %0 {offsets = [3, 0], sizes = [1, 128], strides = [1, 1]} : vector<8x128xf32> to vector<1x128xf32>
      %75 = vector.broadcast %74 : vector<1x128xf32> to vector<8x128xf32>
      %76 = arith.addf %arg8, %75 : vector<8x128xf32>
      %cst_27 = arith.constant dense<0xFF800000> : vector<8xf32>
      %77 = vector.multi_reduction <maximumf>, %76, %cst_27 [1] : vector<8x128xf32> to vector<8xf32>
      %78 = vector.shape_cast %77 : vector<8xf32> to vector<8x1xf32>
      %79 = tpu.reduce_index %76 {axis = 1 : i32, kind = #tpu.reduction_kind<arg_max>} : vector<8x128xf32> -> vector<8xi32>
      %80 = vector.shape_cast %79 : vector<8xi32> to vector<8x1xi32>
      %c3_i32 = arith.constant 3 : i32
      %81 = vector.broadcast %c3_i32 : i32 to vector<8x128xi32>
      %82 = arith.cmpi eq, %1, %81 : vector<8x128xi32>
      %83 = vector.shape_cast %78 : vector<8x1xf32> to vector<8x1xf32>
      %84 = vector.broadcast %83 : vector<8x1xf32> to vector<8x128xf32>
      %85 = arith.select %82, %84, %70 : vector<8x128xi1>, vector<8x128xf32>
      %86 = vector.shape_cast %80 : vector<8x1xi32> to vector<8x1xi32>
      %87 = vector.broadcast %86 : vector<8x1xi32> to vector<8x128xi32>
      %88 = arith.select %82, %87, %73 : vector<8x128xi1>, vector<8x128xi32>
      %89 = vector.extract_strided_slice %0 {offsets = [4, 0], sizes = [1, 128], strides = [1, 1]} : vector<8x128xf32> to vector<1x128xf32>
      %90 = vector.broadcast %89 : vector<1x128xf32> to vector<8x128xf32>
      %91 = arith.addf %arg8, %90 : vector<8x128xf32>
      %cst_28 = arith.constant dense<0xFF800000> : vector<8xf32>
      %92 = vector.multi_reduction <maximumf>, %91, %cst_28 [1] : vector<8x128xf32> to vector<8xf32>
      %93 = vector.shape_cast %92 : vector<8xf32> to vector<8x1xf32>
      %94 = tpu.reduce_index %91 {axis = 1 : i32, kind = #tpu.reduction_kind<arg_max>} : vector<8x128xf32> -> vector<8xi32>
      %95 = vector.shape_cast %94 : vector<8xi32> to vector<8x1xi32>
      %c4_i32 = arith.constant 4 : i32
      %96 = vector.broadcast %c4_i32 : i32 to vector<8x128xi32>
      %97 = arith.cmpi eq, %1, %96 : vector<8x128xi32>
      %98 = vector.shape_cast %93 : vector<8x1xf32> to vector<8x1xf32>
      %99 = vector.broadcast %98 : vector<8x1xf32> to vector<8x128xf32>
      %100 = arith.select %97, %99, %85 : vector<8x128xi1>, vector<8x128xf32>
      %101 = vector.shape_cast %95 : vector<8x1xi32> to vector<8x1xi32>
      %102 = vector.broadcast %101 : vector<8x1xi32> to vector<8x128xi32>
      %103 = arith.select %97, %102, %88 : vector<8x128xi1>, vector<8x128xi32>
      %104 = arith.index_cast %arg7 : i32 to index
      %c0_29 = arith.constant 0 : index
      %c0_30 = arith.constant 0 : index
      %105 = vector.load %arg6[%104, %c0_29, %c0_30] : memref<8x8x128xi32, #tpu.memory_space<vmem>>, vector<1x8x128xi32>
      %106 = vector.shape_cast %105 : vector<1x8x128xi32> to vector<8x128xi32>
      %107 = vector.shape_cast %103 : vector<8x128xi32> to vector<1x8x128xi32>
      tpu.vector_store %arg6[%104, %c0_29, %c0_30], %107 {strides = array<i32>} : memref<8x8x128xi32, #tpu.memory_space<vmem>>, vector<1x8x128xi32>,
      %c0_31 = arith.constant 0 : index
      %108 = arith.index_cast %arg7 : i32 to index
      %c0_32 = arith.constant 0 : index
      %c0_33 = arith.constant 0 : index
      %109 = vector.load %arg1[%c0_31, %108, %c0_32, %c0_33] : memref<2x8x8x128xf32, #tpu.memory_space<vmem>>, vector<1x1x8x128xf32>
      %110 = vector.shape_cast %109 : vector<1x1x8x128xf32> to vector<8x128xf32>
      %111 = arith.addf %100, %110 : vector<8x128xf32>
      %c1_34 = arith.constant 1 : index
      %112 = arith.index_cast %arg7 : i32 to index
      %c0_35 = arith.constant 0 : index
      %c0_36 = arith.constant 0 : index
      %113 = vector.load %arg1[%c1_34, %112, %c0_35, %c0_36] : memref<2x8x8x128xf32, #tpu.memory_space<vmem>>, vector<1x1x8x128xf32>
      %114 = vector.shape_cast %113 : vector<1x1x8x128xf32> to vector<8x128xf32>
      %115 = arith.addf %111, %114 : vector<8x128xf32>
      scf.yield %115 : vector<8x128xf32>
    }
    %c7_i32_11 = arith.constant 7 : i32
    %c0_12 = arith.constant 0 : index
    %c0_13 = arith.constant 0 : index
    %13 = vector.load %arg4[%c0_12, %c0_13] : memref<1x128xf32, #tpu.memory_space<vmem>>, vector<1x128xf32>
    %14 = vector.broadcast %13 : vector<1x128xf32> to vector<8x128xf32>
    %15 = arith.addf %12, %14 : vector<8x128xf32>
    %16 = tpu.reduce_index %15 {axis = 1 : i32, kind = #tpu.reduction_kind<arg_max>} : vector<8x128xf32> -> vector<8xi32>
    %17 = vector.shape_cast %16 : vector<8xi32> to vector<8x1xi32>
    %c7_i32_14 = arith.constant 7 : i32
    %18 = vector.broadcast %c7_i32_14 : i32 to vector<8x128xi32>
    %19 = arith.cmpi eq, %2, %18 : vector<8x128xi32>
    %c0_i32 = arith.constant 0 : i32
    %20 = vector.shape_cast %17 : vector<8x1xi32> to vector<8x1xi32>
    %21 = vector.broadcast %20 : vector<8x1xi32> to vector<8x128xi32>
    %22 = vector.broadcast %c0_i32 : i32 to vector<8x128xi32>
    %23 = arith.select %19, %21, %22 : vector<8x128xi1>, vector<8x128xi32>
    %c0_i32_15 = arith.constant 0 : i32
    %c7_i32_16 = arith.constant 7 : i32
    %24 = arith.addi %c0_i32_15, %c7_i32_16 : i32
    %c1_i32_17 = arith.constant 1 : i32
    %25:2 = scf.for %arg7 = %c0_i32_15 to %24 step %c1_i32_17 iter_args(%arg8 = %23, %arg9 = %17) -> (vector<8x128xi32>, vector<8x1xi32>)  : i32 {
      %c7_i32_21 = arith.constant 7 : i32
      %27 = arith.subi %c7_i32_21, %arg7 : i32
      %28 = arith.index_cast %27 : i32 to index
      %c0_22 = arith.constant 0 : index
      %c0_23 = arith.constant 0 : index
      %29 = vector.load %arg6[%28, %c0_22, %c0_23] : memref<8x8x128xi32, #tpu.memory_space<vmem>>, vector<1x8x128xi32>
      %30 = vector.shape_cast %29 : vector<1x8x128xi32> to vector<8x128xi32>
      %31 = vector.broadcast %arg9 : vector<8x1xi32> to vector<8x128xi32>
      %32 = arith.cmpi eq, %1, %31 : vector<8x128xi32>
      %c0_i32_24 = arith.constant 0 : i32
      %33 = vector.broadcast %c0_i32_24 : i32 to vector<8x128xi32>
      %34 = arith.select %32, %30, %33 : vector<8x128xi1>, vector<8x128xi32>
      %cst = arith.constant dense<0> : vector<8xi32>
      %35 = vector.multi_reduction <add>, %34, %cst [1] : vector<8x128xi32> to vector<8xi32>
      %36 = vector.shape_cast %35 : vector<8xi32> to vector<8x1xi32>
      %c1_i32_25 = arith.constant 1 : i32
      %37 = arith.subi %27, %c1_i32_25 : i32
      %38 = vector.broadcast %37 : i32 to vector<8x128xi32>
      %39 = arith.cmpi eq, %2, %38 : vector<8x128xi32>
      %40 = vector.shape_cast %36 : vector<8x1xi32> to vector<8x1xi32>
      %41 = vector.broadcast %40 : vector<8x1xi32> to vector<8x128xi32>
      %42 = arith.select %39, %41, %arg8 : vector<8x128xi1>, vector<8x128xi32>
      scf.yield %42, %36 : vector<8x128xi32>, vector<8x1xi32>
    }
    %c7_i32_18 = arith.constant 7 : i32
    %c0_19 = arith.constant 0 : index
    %c0_20 = arith.constant 0 : index
    %26 = vector.load %arg5[%c0_19, %c0_20] : memref<8x128xi32, #tpu.memory_space<vmem>>, vector<8x128xi32>
    tpu.vector_store %arg5[%c0_19, %c0_20], %25#0 {strides = array<i32>} : memref<8x128xi32, #tpu.memory_space<vmem>>, vector<8x128xi32>,
    return
  }
  func.func @transform_0(%arg0: i32) -> (i32, i32, i32, i32) {
    %c0_i32 = arith.constant 0 : i32
    %c0_i32_0 = arith.constant 0 : i32
    %c0_i32_1 = arith.constant 0 : i32
    %c0_i32_2 = arith.constant 0 : i32
    return %c0_i32, %c0_i32_0, %arg0, %c0_i32_1 : i32, i32, i32, i32
  }
  func.func @transform_1(%arg0: i32) -> (i32, i32) {
    %c0_i32 = arith.constant 0 : i32
    %c0_i32_0 = arith.constant 0 : i32
    %c0_i32_1 = arith.constant 0 : i32
    return %c0_i32, %c0_i32_0 : i32, i32
  }
  func.func @transform_2(%arg0: i32) -> (i32, i32) {
    %c0_i32 = arith.constant 0 : i32
    %c0_i32_0 = arith.constant 0 : i32
    %c0_i32_1 = arith.constant 0 : i32
    return %c0_i32, %c0_i32_0 : i32, i32
  }
  func.func @transform_3(%arg0: i32) -> (i32, i32) {
    %c0_i32 = arith.constant 0 : i32
    %c0_i32_0 = arith.constant 0 : i32
    %c0_i32_1 = arith.constant 0 : i32
    return %c0_i32, %c0_i32_0 : i32, i32
  }
  func.func @transform_4(%arg0: i32) -> (i32, i32) {
    %c0_i32 = arith.constant 0 : i32
    %c0_i32_0 = arith.constant 0 : i32
    return %arg0, %c0_i32 : i32, i32
  }
}

</mosaic_0001>

<bundles_post_ra>
// kernel: bilstm_crf_forward.5
= control target key start
LH: loop header
LB: loop body
LE: loop exit
PB: predicated region body
PF: predicated region fallthrough
CT: control target
= control target key end

     0   :  { %v18_v0 = vlaneseq  ;;  %s375_s0 = inlined_call_operand.vmem [shape: f32[2,8,8,128], index: 0, kind: input, shape index: {}]   ;;  %s376_s1 = inlined_call_operand.vmem [shape: f32[8,128], index: 1, kind: input, shape index: {}]   ;;  %s377_s2 = inlined_call_operand.vmem [shape: f32[1,128], index: 2, kind: input, shape index: {}]   ;;  %s378_s3 = inlined_call_operand.vmem [shape: f32[1,128], index: 3, kind: input, shape index: {}]   ;;  %s379_s4 = inlined_call_operand.vmem [shape: s32[8,128], index: 4, kind: output, shape index: {}]  }
   0x1   :  { %v299_v1 = vld [vmem:[%s376_s1] sm:$0xff]  ;;  %s315_s1 = smov 1  }
   0x2   :  { %v184_v2 = vld [vmem:[%s377_s2] ss:$0 sm:$0xff]  ;;  %v308_v4 = vand.u32 127, %v18_v0 }
   0x3   :  { %v21_v3 = vld [vmem:[%s375_s0] sm:$0xff] }
   0x4   :  { %v28_v5 = vadd.f32 %v184_v2, %v21_v3  ;;  %v185_v6 = vld [vmem:[%s375_s0 + $0x40] sm:$0xff] }
   0x6   :  { %v31_v7 = vadd.f32 %v185_v6, %v28_v5  }
   0x7 LB: > { %v40_v8 = vshrl.u32 %v18_v0, 7  ;;  %vm48_vm0 = vcmp.eq.s32.totalorder %v308_v4, 0  ;;  %vm60_vm1 = vcmp.eq.s32.totalorder %v308_v4, 1  ;;  %s186_s2 = sshll.u32 %s257_s1, 3  ;;  %vm72_vm2 = vcmp.eq.s32.totalorder %v308_v4, 2  ;;  %s37_s1 = sadd.s32 1, %s257_s1   ;;  %s257_s1 = sphi %s315_s1, %s37_s1   ;;  %v253_v7 = vphi %v31_v7, %v380_v7  }
   0x8   : > { %s102_s25 = scalar_lea.vmem %s375_s0, %s186_s2  ;;  %vm84_vm3 = vcmp.eq.s32.totalorder %v308_v4, 3  ;;  %vm96_vm4 = vcmp.eq.s32.totalorder %v308_v4, 4  ;;  %s100_s26 = scalar_lea.vmem [#allocation2], %s186_s2 }
   0x9   : > { %v41_v9 = vsub.s32 0, %v40_v8  ;;  %v65_v10 = vsub.s32 2, %v40_v8  ;;  %v53_v11 = vsub.s32 1, %v40_v8  ;;  %v77_v15 = vsub.s32 3, %v40_v8  ;;  %v103_v33 = vld [vmem:[%s102_s25] sm:$0xff]  ;;  %p34_p0 = scmp.ge.s32.totalorder %s37_s1, 8  }
   0xa   : > { %v89_v20 = vsub.s32 4, %v40_v8  ;;  %v188_v37 = vld [vmem:[%s102_s25 + $0x40] sm:$0xff]  ;;  %vm119_vm5 = vcmp.eq.s32.totalorder (%p34_p0), %v308_v4, 7  ;;  %s365_s29 = smov (%p34_p0), 0  }
   0xb   : > { %v42_v12 = vrot.slane %v299_v1, %v41_v9  ;;  %v66_v13 = vrot.slane %v299_v1, %v65_v10  ;;  %v54_v14 = vrot.slane %v299_v1, %v53_v11  ;;  %v78_v19 = vrot.slane %v299_v1, %v77_v15  ;;  %v189_v48 = vld [vmem:[%s378_s3] ss:$0 sm:$0xff] (%p34_p0) }
   0xc   : > { %v90_v22 = vrot.slane %v299_v1, %v89_v20 }
   0xd   : > { %v43_v16 = vadd.f32 %v253_v7, %v42_v12  ;;  %v67_v17 = vadd.f32 %v253_v7, %v66_v13  ;;  %v55_v18 = vadd.f32 %v253_v7, %v54_v14  ;;  %v79_v21 = vadd.f32 %v253_v7, %v78_v19 }
   0xe   : > { %v91_v23 = vadd.f32 %v253_v7, %v90_v22 }
   0xf   : > { %46 = vmax.index.xlane.f32.xlu1 %v43_v16  ;;  %44 = vmax.xlane.f32.xlu0 %v43_v16 }
  0x13   : > { %68 = vmax.xlane.f32.xlu1 %v67_v17  ;;  %56 = vmax.xlane.f32.xlu0 %v55_v18 }
  0x17   : > { %80 = vmax.xlane.f32.xlu1 %v79_v21  ;;  %58 = vmax.index.xlane.f32.xlu0 %v55_v18 }
  0x1b   : > { %92 = vmax.xlane.f32.xlu1 %v91_v23  ;;  %70 = vmax.index.xlane.f32.xlu0 %v67_v17 }
  0x1f   : > { %82 = vmax.index.xlane.f32.xlu0 %v79_v21  ;;  %94 = vmax.index.xlane.f32.xlu1 %v91_v23 }
  0x9c   : > { %v47_v24 = vpop.xlane.xlu1 %46  ;;  %v45_v25 = vpop.xlane.xlu0 %44 }
  0x9d   : > { %v49_v28 = vsel %vm48_vm0, %v45_v25, -1e+30  ;;  %v50_v39 = vsel %vm48_vm0, %v47_v24, 0 }
  0xa0   : > { %v69_v26 = vpop.xlane.xlu1 %68  ;;  %v57_v27 = vpop.xlane.xlu0 %56 }
  0xa1   : > { %v61_v29 = vsel %vm60_vm1, %v57_v27, %v49_v28 }
  0xa2   : > { %v73_v32 = vsel %vm72_vm2, %v69_v26, %v61_v29 }
  0xa4   : > { %v81_v30 = vpop.xlane.xlu1 %80  ;;  %v59_v31 = vpop.xlane.xlu0 %58 }
  0xa5   : > { %v85_v34 = vsel %vm84_vm3, %v81_v30, %v73_v32  ;;  %v62_v41 = vsel %vm60_vm1, %v59_v31, %v50_v39 }
  0xa8   : > { %v93_v35 = vpop.xlane.xlu1 %92  ;;  %v71_v36 = vpop.xlane.xlu0 %70 }
  0xa9   : > { %v97_v38 = vsel %vm96_vm4, %v93_v35, %v85_v34  ;;  %v74_v43 = vsel %vm72_vm2, %v71_v36, %v62_v41  ;;  %36 = sbr.rel (!%p34_p0) target bundleno = 7 (0x7), region = 55 }
  0xaa   : > { %v104_v40 = vadd.f32 %v103_v33, %v97_v38 }
  0xac   : > { %v108_v42 = vadd.f32 %v188_v37, %v104_v40   ;;  %v83_v44 = vpop.xlane.xlu0 %82  ;;  %v95_v45 = vpop.xlane.xlu1 %94 }
  0xad   : > { %v86_v46 = vsel %vm84_vm3, %v83_v44, %v74_v43 }
  0xae   : > { %v98_v47 = vsel %vm96_vm4, %v95_v45, %v86_v46  ;;  %v380_v7 = vmov %v108_v42  ;;  %v116_v49 = vadd.f32 (%p34_p0), %v189_v48, %v108_v42 }
  0xaf   : > { %101 = vst [vmem:[%s100_s26] sm:$0xff] %v98_v47 }
  0xb0   :  { %117 = vmax.index.xlane.f32.xlu0 %v116_v49 }
 0x13d   :  { %v118_v50 = vpop.xlane.xlu0 %117  }
 0x13e   :  { %v120_v51 = vsel %vm119_vm5, %v118_v50, 0   ;;  %v259_v52 = vmov %v118_v50  }
 0x13f   :  { %v263_v53 = vmov %v120_v51  }
 0x140 LB: > { %s129_s0 = ssub.s32 7, %s269_s29  ;;  %vm133_vm6 = vcmp.eq.s32.totalorder %v308_v4, %v261_v52  ;;  %s147_s5 = ssub.s32 6, %s269_s29  ;;  %s269_s29 = sphi %s365_s29, %s126_s29   ;;  %v265_v53 = vphi %v263_v53, %v264_v53   ;;  %v261_v52 = vphi %v259_v52, %v146_v52  }
 0x141   : > { %s190_s30 = sshll.u32 %s129_s0, 3  ;;  %v148_v62 = vstv %s147_s5  ;;  %s126_s29 = sadd.s32 1, %s269_s29  }
 0x142   : > { %s131_s3 = scalar_lea.vmem [#allocation2], %s190_s30  ;;  %vm149_vm7 = vcmp.eq.s32.totalorder %v308_v4, %v148_v62  ;;  %p123_p1 = scmp.ge.s32.totalorder %s126_s29, 7  }
 0x143   : > { %v132_v54 = vld [vmem:[%s131_s3] sm:$0xff] }
 0x144   : > { %v134_v55 = vsel %vm133_vm6, %v132_v54, 0 }
 0x145   : > { %v136_v56 = vshrl.u32 %v134_v55, 16  ;;  %v135_v57 = vand.u32 65535, %v134_v55 }
 0x147   : > { %v138_v58 = vcvt.s32.f32 %v136_v56  ;;  %v137_v59 = vcvt.s32.f32 %v135_v57 }
 0x149   : > { %141 = vadd.xlane.f32.xlu0 %v138_v58 }
 0x14d   : > { %139 = vadd.xlane.f32.xlu0 %v137_v59 }
 0x1d6   : > { %v142_v60 = vpop.xlane.xlu0 %141 }
 0x1d7   : > { %v144_v61 = vcvt.f32.s32 %v142_v60 }
 0x1d9   : > { %v145_v0 = vshll.u32 %v144_v61, 16 }
 0x1da   : > { %v140_v63 = vpop.xlane.xlu0 %139  ;;  %125 = sbr.rel (!%p123_p1) target bundleno = 320 (0x140), region = 66 }
 0x1db   : > { %v143_v1 = vcvt.f32.s32 %v140_v63 }
 0x1dd   : > { %v146_v52 = vadd.s32 %v145_v0, %v143_v1  }
 0x1df   : > { %v150_v2 = vsel %vm149_vm7, %v146_v52, %v265_v53  }
 0x1e0   : > { %v264_v53 = vmov %v150_v2   ;;  %151 = vst [vmem:[%s379_s4] sm:$0xff] (%p123_p1), %v150_v2 }

// kernel: bilstm_crf_forward.3
= control target key start
LH: loop header
LB: loop body
LE: loop exit
PB: predicated region body
PF: predicated region fallthrough
CT: control target
= control target key end

     0   :  { %v706_v3 = vmov 0.0   ;;  %vm96_vm0 = vcmask 261120   ;;  %v56_v57 = vlaneseq  ;;  %s1212_s1 = inlined_call_operand.vmem [shape: f32[32,1024], index: 1, kind: input, shape index: {}]   ;;  %s1213_s0 = inlined_call_operand.vmem [shape: f32[64,32], index: 0, kind: input, shape index: {}]   ;;  %s1214_s2 = inlined_call_operand.vmem [shape: f32[1,1024], index: 2, kind: input, shape index: {}]   ;;  %s1215_s3 = inlined_call_operand.vmem [shape: f32[64,1024], index: 3, kind: output, shape index: {}]  }
   0x1   :  { %v23_v0 = vld [vmem:[%s1212_s1 + $0x8] sm:$0xff]  ;;  %v25_v2 = vld [vmem:[%s1212_s1 + $0x18] sm:$0xff]  ;;  %185 = vmatprep.mubr.f32.mxu0 %v706_v3  ;;  %298 = vmatprep.mubr.f32.mxu1 %v706_v3  ;;  %v22_v6 = vld [vmem:[%s1212_s1] sm:$0xff] }
   0x2   :  { %v31_v1 = vld [vmem:[%s1212_s1 + $0x48] sm:$0xff]  ;;  %v33_v5 = vld [vmem:[%s1212_s1 + $0x58] sm:$0xff]  ;;  %v30_v7 = vld [vmem:[%s1212_s1 + $0x40] sm:$0xff]  ;;  %v917_v58 = vshrl.u32 %v56_v57, 7 }
   0x3   :  { %v673_v4 = vpack.c.bf16 %v31_v1, %v23_v0  ;;  %v681_v8 = vpack.c.bf16 %v33_v5, %v25_v2  ;;  %v675_v9 = vpack.c.bf16 %v30_v7, %v22_v6  ;;  %v24_v10 = vld [vmem:[%s1212_s1 + $0x10] sm:$0xff]  ;;  %v39_v12 = vld [vmem:[%s1212_s1 + $0x88] sm:$0xff]  ;;  %v41_v15 = vld [vmem:[%s1212_s1 + $0x98] sm:$0xff] }
   0x4   :  { %v32_v11 = vld [vmem:[%s1212_s1 + $0x50] sm:$0xff]  ;;  %v47_v14 = vld [vmem:[%s1212_s1 + $0xc8] sm:$0xff]  ;;  %v49_v16 = vld [vmem:[%s1212_s1 + $0xd8] sm:$0xff]  ;;  %v58_v59 = vsub.s32 0, %v917_v58  ;;  %v66_v61 = vsub.s32 2, %v917_v58  ;;  %v62_v62 = vsub.s32 1, %v917_v58 }
   0x5   :  { %674 = vmatprep.subr.bf16.mxu0 %v673_v4  ;;  %v683_v13 = vpack.c.bf16 %v32_v11, %v24_v10  ;;  %682 = vmatprep.subr.bf16.mxu1 %v681_v8  ;;  %v677_v17 = vpack.c.bf16 %v47_v14, %v39_v12  ;;  %v685_v18 = vpack.c.bf16 %v49_v16, %v41_v15  ;;  %v38_v19 = vld [vmem:[%s1212_s1 + $0x80] sm:$0xff]  ;;  %v40_v21 = vld [vmem:[%s1212_s1 + $0x90] sm:$0xff]  ;;  %v27_v24 = vld [vmem:[%s1212_s1 + $0x28] sm:$0xff]  ;;  %v70_v63 = vsub.s32 3, %v917_v58 }
   0x6   :  { %676 = vmatpush1.bf16.msra.mxu0 %v675_v9  ;;  %v46_v20 = vld [vmem:[%s1212_s1 + $0xc0] sm:$0xff]  ;;  %v48_v23 = vld [vmem:[%s1212_s1 + $0xd0] sm:$0xff]  ;;  %v35_v26 = vld [vmem:[%s1212_s1 + $0x68] sm:$0xff] }
   0x7   :  { %684 = vmatpush1.bf16.msra.mxu1 %v683_v13  ;;  %v679_v22 = vpack.c.bf16 %v46_v20, %v38_v19  ;;  %678 = vmatprep.subr.bf16.mxu0 %v677_v17  ;;  %v687_v25 = vpack.c.bf16 %v48_v23, %v40_v21  ;;  %v29_v27 = vld [vmem:[%s1212_s1 + $0x38] sm:$0xff]  ;;  %v689_v29 = vpack.c.bf16 %v35_v26, %v27_v24  ;;  %v26_v31 = vld [vmem:[%s1212_s1 + $0x20] sm:$0xff]  ;;  %v28_v33 = vld [vmem:[%s1212_s1 + $0x30] sm:$0xff] }
   0x8   :  { %686 = vmatprep.subr.bf16.mxu1 %v685_v18  ;;  %v37_v28 = vld [vmem:[%s1212_s1 + $0x78] sm:$0xff]  ;;  %v34_v32 = vld [vmem:[%s1212_s1 + $0x60] sm:$0xff]  ;;  %v36_v36 = vld [vmem:[%s1212_s1 + $0x70] sm:$0xff] }
   0x9   :  { %v697_v30 = vpack.c.bf16 %v37_v28, %v29_v27  ;;  %v801_v34 = vld [vmem:[%s1213_s0] sm:$0xff]  ;;  %v691_v35 = vpack.c.bf16 %v34_v32, %v26_v31  ;;  %v699_v37 = vpack.c.bf16 %v36_v36, %v28_v33  ;;  %v43_v38 = vld [vmem:[%s1212_s1 + $0xa8] sm:$0xff]  ;;  %v45_v40 = vld [vmem:[%s1212_s1 + $0xb8] sm:$0xff] }
   0xa   :  { %680 = vmatpush1.bf16.msra.mxu0 %v679_v22  ;;  %v51_v39 = vld [vmem:[%s1212_s1 + $0xe8] sm:$0xff]  ;;  %v53_v41 = vld [vmem:[%s1212_s1 + $0xf8] sm:$0xff]  ;;  %v42_v44 = vld [vmem:[%s1212_s1 + $0xa0] sm:$0xff] }
   0xb   :  { %688 = vmatpush1.bf16.msra.mxu1 %v687_v25  ;;  %690 = vmatprep.subr.bf16.mxu0 %v689_v29  ;;  %v693_v42 = vpack.c.bf16 %v51_v39, %v43_v38  ;;  %v701_v43 = vpack.c.bf16 %v53_v41, %v45_v40  ;;  %v50_v45 = vld [vmem:[%s1212_s1 + $0xe0] sm:$0xff]  ;;  %v44_v46 = vld [vmem:[%s1212_s1 + $0xb0] sm:$0xff]  ;;  %v15_v47 = vld [vmem:[%s1213_s0 + $0x8] sm:$0xff] }
   0xc   :  { %698 = vmatprep.subr.bf16.mxu1 %v697_v30  ;;  %v52_v48 = vld [vmem:[%s1212_s1 + $0xf0] sm:$0xff]  ;;  %v695_v49 = vpack.c.bf16 %v50_v45, %v42_v44  ;;  %v17_v52 = vld [vmem:[%s1213_s0 + $0x18] sm:$0xff]  ;;  %v18_v53 = vld [vmem:[%s1213_s0 + $0x20] sm:$0xff] }
   0xd   :  { %641 = vmatmul.mubr.msk.f32.vlgmr.msra.gmra.mrb[0].mxu0 %vm96_vm0, %v801_v34  ;;  %v703_v50 = vpack.c.bf16 %v52_v48, %v44_v46  ;;  %v16_v51 = vld [vmem:[%s1213_s0 + $0x10] sm:$0xff]  ;;  %v19_v54 = vld [vmem:[%s1213_s0 + $0x28] sm:$0xff]  ;;  %v21_v56 = vld [vmem:[%s1213_s0 + $0x38] sm:$0xff] }
   0xe   :  { %649 = vmatmul.mubr.msk.f32.vlgmr.msra.gmra.mrb[0].mxu1 %vm96_vm0, %v801_v34  ;;  %692 = vmatpush1.bf16.msra.mxu0 %v691_v35  ;;  %v20_v55 = vld [vmem:[%s1213_s0 + $0x30] sm:$0xff]  ;;  %v923_v60 = vld [vmem:[%s1214_s2] sm:$0xff] }
   0xf   :  { %700 = vmatpush1.bf16.msra.mxu1 %v699_v37  ;;  %191 = vmatprep.mubr.f32.mxu0 %v706_v3  ;;  %v929_v0 = vrot.slane %v923_v60, %v58_v59  ;;  %v932_v1 = vrot.slane %v923_v60, %v66_v61  ;;  %v935_v2 = vrot.slane %v923_v60, %v62_v62  ;;  %v82_v62 = vsub.s32 6, %v917_v58 }
  0x10   :  { %304 = vmatprep.mubr.f32.mxu1 %v706_v3  ;;  %694 = vmatprep.subr.bf16.mxu0 %v693_v42 }
  0x11   :  { %642 = vmatmul.mubr.msk.f32.gmra.mrb[2].mxu0 %vm96_vm0, %v15_v47  ;;  %702 = vmatprep.subr.bf16.mxu1 %v701_v43 }
  0x12   :  { %650 = vmatmul.mubr.msk.f32.gmra.mrb[2].mxu1 %vm96_vm0, %v15_v47  ;;  %197 = vmatprep.mubr.f32.mxu0 %v706_v3 }
  0x13   :  { %310 = vmatprep.mubr.f32.mxu1 %v706_v3  ;;  %696 = vmatpush1.bf16.msra.mxu0 %v695_v49 }
  0x14   :  { %704 = vmatpush1.bf16.msra.mxu1 %v703_v50 }
  0x15   :  { %643 = vmatmul.mubr.msk.f32.gmra.mrb[4].mxu0 %vm96_vm0, %v16_v51 }
  0x16   :  { %651 = vmatmul.mubr.msk.f32.gmra.mrb[4].mxu1 %vm96_vm0, %v16_v51  ;;  %203 = vmatprep.mubr.f32.mxu0 %v706_v3 }
  0x17   :  { %316 = vmatprep.mubr.f32.mxu1 %v706_v3 }
  0x19   :  { %644 = vmatmul.mubr.msk.f32.gmra.mrb[6].mxu0 %vm96_vm0, %v17_v52 }
  0x1a   :  { %652 = vmatmul.mubr.msk.f32.gmra.mrb[6].mxu1 %vm96_vm0, %v17_v52  ;;  %209 = vmatprep.mubr.f32.mxu0 %v706_v3 }
  0x1b   :  { %322 = vmatprep.mubr.f32.mxu1 %v706_v3 }
  0x1d   :  { %645 = vmatmul.mubr.msk.f32.gmra.mrb[8].mxu0 %vm96_vm0, %v18_v53 }
  0x1e   :  { %653 = vmatmul.mubr.msk.f32.gmra.mrb[8].mxu1 %vm96_vm0, %v18_v53  ;;  %215 = vmatprep.mubr.f32.mxu0 %v706_v3 }
  0x1f   :  { %328 = vmatprep.mubr.f32.mxu1 %v706_v3 }
  0x21   :  { %646 = vmatmul.mubr.msk.f32.gmra.mrb[10].mxu0 %vm96_vm0, %v19_v54 }
  0x22   :  { %654 = vmatmul.mubr.msk.f32.gmra.mrb[10].mxu1 %vm96_vm0, %v19_v54  ;;  %221 = vmatprep.mubr.f32.mxu0 %v706_v3 }
  0x23   :  { %334 = vmatprep.mubr.f32.mxu1 %v706_v3 }
  0x25   :  { %647 = vmatmul.mubr.msk.f32.gmra.mrb[12].mxu0 %vm96_vm0, %v20_v55 }
  0x26   :  { %655 = vmatmul.mubr.msk.f32.gmra.mrb[12].mxu1 %vm96_vm0, %v20_v55  ;;  %227 = vmatprep.mubr.f32.mxu0 %v706_v3 }
  0x27   :  { %340 = vmatprep.mubr.f32.mxu1 %v706_v3 }
  0x29   :  { %648 = vmatmul.mubr.msk.f32.gmra.mrb[14].mxu0 %vm96_vm0, %v21_v56 }
  0x2a   :  { %656 = vmatmul.mubr.msk.f32.gmra.mrb[14].mxu1 %vm96_vm0, %v21_v56  ;;  %411 = vmatprep.mubr.f32.mxu0 %v706_v3 }
  0x2b   :  { %524 = vmatprep.mubr.f32.mxu1 %v706_v3 }
  0x2d   :  { %657 = vmatmul.mubr.msk.f32.vlgmr.msra.gmra.mrb[16].mxu0 %vm96_vm0, %v801_v34 }
  0x2e   :  { %665 = vmatmul.mubr.msk.f32.vlgmr.msra.gmra.mrb[16].mxu1 %vm96_vm0, %v801_v34  ;;  %417 = vmatprep.mubr.f32.mxu0 %v706_v3 }
  0x2f   :  { %530 = vmatprep.mubr.f32.mxu1 %v706_v3 }
  0x31   :  { %658 = vmatmul.mubr.msk.f32.gmra.mrb[18].mxu0 %vm96_vm0, %v15_v47 }
  0x32   :  { %666 = vmatmul.mubr.msk.f32.gmra.mrb[18].mxu1 %vm96_vm0, %v15_v47  ;;  %423 = vmatprep.mubr.f32.mxu0 %v706_v3 }
  0x33   :  { %536 = vmatprep.mubr.f32.mxu1 %v706_v3 }
  0x35   :  { %659 = vmatmul.mubr.msk.f32.gmra.mrb[20].mxu0 %vm96_vm0, %v16_v51 }
  0x36   :  { %667 = vmatmul.mubr.msk.f32.gmra.mrb[20].mxu1 %vm96_vm0, %v16_v51  ;;  %429 = vmatprep.mubr.f32.mxu0 %v706_v3 }
  0x37   :  { %542 = vmatprep.mubr.f32.mxu1 %v706_v3 }
  0x39   :  { %660 = vmatmul.mubr.msk.f32.gmra.mrb[22].mxu0 %vm96_vm0, %v17_v52 }
  0x3a   :  { %668 = vmatmul.mubr.msk.f32.gmra.mrb[22].mxu1 %vm96_vm0, %v17_v52  ;;  %435 = vmatprep.mubr.f32.mxu0 %v706_v3 }
  0x3b   :  { %548 = vmatprep.mubr.f32.mxu1 %v706_v3 }
  0x3d   :  { %661 = vmatmul.mubr.msk.f32.gmra.mrb[24].mxu0 %vm96_vm0, %v18_v53 }
  0x3e   :  { %669 = vmatmul.mubr.msk.f32.gmra.mrb[24].mxu1 %vm96_vm0, %v18_v53  ;;  %441 = vmatprep.mubr.f32.mxu0 %v706_v3 }
  0x3f   :  { %554 = vmatprep.mubr.f32.mxu1 %v706_v3 }
  0x41   :  { %662 = vmatmul.mubr.msk.f32.gmra.mrb[26].mxu0 %vm96_vm0, %v19_v54 }
  0x42   :  { %670 = vmatmul.mubr.msk.f32.gmra.mrb[26].mxu1 %vm96_vm0, %v19_v54  ;;  %447 = vmatprep.mubr.f32.mxu0 %v706_v3 }
  0x43   :  { %560 = vmatprep.mubr.f32.mxu1 %v706_v3 }
  0x45   :  { %663 = vmatmul.mubr.msk.f32.gmra.mrb[28].mxu0 %vm96_vm0, %v20_v55 }
  0x46   :  { %671 = vmatmul.mubr.msk.f32.gmra.mrb[28].mxu1 %vm96_vm0, %v20_v55  ;;  %453 = vmatprep.mubr.f32.mxu0 %v706_v3 }
  0x47   :  { %566 = vmatprep.mubr.f32.mxu1 %v706_v3  ;;  %v938_v3 = vrot.slane %v923_v60, %v70_v63  ;;  %v78_v63 = vsub.s32 5, %v917_v58 }
  0x49   :  { %664 = vmatmul.mubr.msk.f32.gmra.mrb[30].mxu0 %vm96_vm0, %v21_v56 }
  0x4a   :  { %672 = vmatmul.mubr.msk.f32.gmra.mrb[30].mxu1 %vm96_vm0, %v21_v56  ;;  %v74_v56 = vsub.s32 4, %v917_v58 }
  0xe0   :  { %v187_v4 = vpop.f32.mrb[0].mxu0 }
  0xe1   :  { %v188_v5 = vadd.f32 %v187_v4, %v929_v0  ;;  %v300_v6 = vpop.f32.mrb[0].mxu1  ;;  %v189_v7 = vpop.f32.mrb[1].mxu0 }
  0xe2   :  { %v301_v8 = vadd.f32 %v300_v6, %v932_v1  ;;  %v190_v9 = vadd.f32 %v189_v7, %v935_v2  ;;  %v302_v10 = vpop.f32.mrb[1].mxu1 }
  0xe3   :  { %573 = vst [vmem:[%s1215_s3] sm:$0xff] %v188_v5  ;;  %v303_v11 = vadd.f32 %v302_v10, %v938_v3  ;;  %v86_v5 = vsub.s32 7, %v917_v58  ;;  %v1058_v10 = vrot.slane %v923_v60, %v74_v56 }
  0xe4   :  { %575 = vst [vmem:[%s1215_s3 + $0x10] sm:$0xff] %v301_v8  ;;  %574 = vst [vmem:[%s1215_s3 + $0x8] sm:$0xff] %v190_v9  ;;  %v193_v12 = vpop.f32.mrb[2].mxu0 }
  0xe5   :  { %576 = vst [vmem:[%s1215_s3 + $0x18] sm:$0xff] %v303_v11  ;;  %v194_v13 = vadd.f32 %v193_v12, %v929_v0  ;;  %v306_v14 = vpop.f32.mrb[2].mxu1  ;;  %v195_v15 = vpop.f32.mrb[3].mxu0 }
  0xe6   :  { %v307_v16 = vadd.f32 %v306_v14, %v932_v1  ;;  %v196_v17 = vadd.f32 %v195_v15, %v935_v2  ;;  %v308_v18 = vpop.f32.mrb[3].mxu1  ;;  %v1066_v14 = vrot.slane %v923_v60, %v78_v63  ;;  %v1073_v15 = vrot.slane %v923_v60, %v86_v5 }
  0xe7   :  { %581 = vst [vmem:[%s1215_s3 + $0x40] sm:$0xff] %v194_v13  ;;  %v309_v19 = vadd.f32 %v308_v18, %v938_v3  ;;  %v1063_v13 = vrot.slane %v923_v60, %v82_v62 }
  0xe8   :  { %583 = vst [vmem:[%s1215_s3 + $0x50] sm:$0xff] %v307_v16  ;;  %582 = vst [vmem:[%s1215_s3 + $0x48] sm:$0xff] %v196_v17  ;;  %v199_v20 = vpop.f32.mrb[4].mxu0 }
  0xe9   :  { %584 = vst [vmem:[%s1215_s3 + $0x58] sm:$0xff] %v309_v19  ;;  %v200_v21 = vadd.f32 %v199_v20, %v929_v0  ;;  %v312_v22 = vpop.f32.mrb[4].mxu1  ;;  %v201_v23 = vpop.f32.mrb[5].mxu0 }
  0xea   :  { %v313_v24 = vadd.f32 %v312_v22, %v932_v1  ;;  %v202_v25 = vadd.f32 %v201_v23, %v935_v2  ;;  %v314_v26 = vpop.f32.mrb[5].mxu1 }
  0xeb   :  { %589 = vst [vmem:[%s1215_s3 + $0x80] sm:$0xff] %v200_v21  ;;  %v315_v27 = vadd.f32 %v314_v26, %v938_v3 }
  0xec   :  { %591 = vst [vmem:[%s1215_s3 + $0x90] sm:$0xff] %v313_v24  ;;  %590 = vst [vmem:[%s1215_s3 + $0x88] sm:$0xff] %v202_v25  ;;  %v205_v28 = vpop.f32.mrb[6].mxu0 }
  0xed   :  { %592 = vst [vmem:[%s1215_s3 + $0x98] sm:$0xff] %v315_v27  ;;  %v206_v29 = vadd.f32 %v205_v28, %v929_v0  ;;  %v318_v30 = vpop.f32.mrb[6].mxu1  ;;  %v207_v31 = vpop.f32.mrb[7].mxu0 }
  0xee   :  { %v319_v32 = vadd.f32 %v318_v30, %v932_v1  ;;  %v208_v33 = vadd.f32 %v207_v31, %v935_v2  ;;  %v320_v34 = vpop.f32.mrb[7].mxu1 }
  0xef   :  { %597 = vst [vmem:[%s1215_s3 + $0xc0] sm:$0xff] %v206_v29  ;;  %v321_v35 = vadd.f32 %v320_v34, %v938_v3 }
  0xf0   :  { %599 = vst [vmem:[%s1215_s3 + $0xd0] sm:$0xff] %v319_v32  ;;  %598 = vst [vmem:[%s1215_s3 + $0xc8] sm:$0xff] %v208_v33  ;;  %v211_v36 = vpop.f32.mrb[8].mxu0 }
  0xf1   :  { %600 = vst [vmem:[%s1215_s3 + $0xd8] sm:$0xff] %v321_v35  ;;  %v212_v37 = vadd.f32 %v211_v36, %v929_v0  ;;  %v324_v38 = vpop.f32.mrb[8].mxu1  ;;  %v213_v39 = vpop.f32.mrb[9].mxu0 }
  0xf2   :  { %v325_v40 = vadd.f32 %v324_v38, %v932_v1  ;;  %v214_v41 = vadd.f32 %v213_v39, %v935_v2  ;;  %v326_v42 = vpop.f32.mrb[9].mxu1 }
  0xf3   :  { %605 = vst [vmem:[%s1215_s3 + $0x100] sm:$0xff] %v212_v37  ;;  %v327_v43 = vadd.f32 %v326_v42, %v938_v3 }
  0xf4   :  { %607 = vst [vmem:[%s1215_s3 + $0x110] sm:$0xff] %v325_v40  ;;  %606 = vst [vmem:[%s1215_s3 + $0x108] sm:$0xff] %v214_v41  ;;  %v217_v44 = vpop.f32.mrb[10].mxu0 }
  0xf5   :  { %608 = vst [vmem:[%s1215_s3 + $0x118] sm:$0xff] %v327_v43  ;;  %v218_v45 = vadd.f32 %v217_v44, %v929_v0  ;;  %v330_v46 = vpop.f32.mrb[10].mxu1  ;;  %v219_v47 = vpop.f32.mrb[11].mxu0 }
  0xf6   :  { %v331_v48 = vadd.f32 %v330_v46, %v932_v1  ;;  %v220_v49 = vadd.f32 %v219_v47, %v935_v2  ;;  %v332_v50 = vpop.f32.mrb[11].mxu1 }
  0xf7   :  { %613 = vst [vmem:[%s1215_s3 + $0x140] sm:$0xff] %v218_v45  ;;  %v333_v51 = vadd.f32 %v332_v50, %v938_v3 }
  0xf8   :  { %615 = vst [vmem:[%s1215_s3 + $0x150] sm:$0xff] %v331_v48  ;;  %614 = vst [vmem:[%s1215_s3 + $0x148] sm:$0xff] %v220_v49  ;;  %v223_v52 = vpop.f32.mrb[12].mxu0 }
  0xf9   :  { %616 = vst [vmem:[%s1215_s3 + $0x158] sm:$0xff] %v333_v51  ;;  %v224_v53 = vadd.f32 %v223_v52, %v929_v0  ;;  %v336_v54 = vpop.f32.mrb[12].mxu1  ;;  %v225_v55 = vpop.f32.mrb[13].mxu0 }
  0xfa   :  { %v337_v57 = vadd.f32 %v336_v54, %v932_v1  ;;  %v226_v59 = vadd.f32 %v225_v55, %v935_v2  ;;  %v338_v61 = vpop.f32.mrb[13].mxu1 }
  0xfb   :  { %621 = vst [vmem:[%s1215_s3 + $0x180] sm:$0xff] %v224_v53  ;;  %v339_v4 = vadd.f32 %v338_v61, %v938_v3 }
  0xfc   :  { %623 = vst [vmem:[%s1215_s3 + $0x190] sm:$0xff] %v337_v57  ;;  %622 = vst [vmem:[%s1215_s3 + $0x188] sm:$0xff] %v226_v59  ;;  %v229_v6 = vpop.f32.mrb[14].mxu0 }
  0xfd   :  { %624 = vst [vmem:[%s1215_s3 + $0x198] sm:$0xff] %v339_v4  ;;  %v230_v7 = vadd.f32 %v229_v6, %v929_v0  ;;  %v342_v8 = vpop.f32.mrb[14].mxu1  ;;  %v231_v9 = vpop.f32.mrb[15].mxu0 }
  0xfe   :  { %v343_v58 = vadd.f32 %v342_v8, %v932_v1  ;;  %v232_v11 = vadd.f32 %v231_v9, %v935_v2  ;;  %v344_v12 = vpop.f32.mrb[15].mxu1 }
  0xff   :  { %629 = vst [vmem:[%s1215_s3 + $0x1c0] sm:$0xff] %v230_v7  ;;  %v345_v0 = vadd.f32 %v344_v12, %v938_v3 }
 0x100   :  { %631 = vst [vmem:[%s1215_s3 + $0x1d0] sm:$0xff] %v343_v58  ;;  %630 = vst [vmem:[%s1215_s3 + $0x1c8] sm:$0xff] %v232_v11  ;;  %v413_v1 = vpop.f32.mrb[16].mxu0 }
 0x101   :  { %632 = vst [vmem:[%s1215_s3 + $0x1d8] sm:$0xff] %v345_v0  ;;  %v414_v2 = vadd.f32 %v413_v1, %v1058_v10  ;;  %v526_v16 = vpop.f32.mrb[16].mxu1  ;;  %v415_v3 = vpop.f32.mrb[17].mxu0 }
 0x102   :  { %v527_v60 = vadd.f32 %v526_v16, %v1063_v13  ;;  %v416_v17 = vadd.f32 %v415_v3, %v1066_v14  ;;  %v528_v18 = vpop.f32.mrb[17].mxu1 }
 0x103   :  { %577 = vst [vmem:[%s1215_s3 + $0x20] sm:$0xff] %v414_v2  ;;  %v529_v19 = vadd.f32 %v528_v18, %v1073_v15 }
 0x104   :  { %579 = vst [vmem:[%s1215_s3 + $0x30] sm:$0xff] %v527_v60  ;;  %578 = vst [vmem:[%s1215_s3 + $0x28] sm:$0xff] %v416_v17  ;;  %v419_v20 = vpop.f32.mrb[18].mxu0 }
 0x105   :  { %580 = vst [vmem:[%s1215_s3 + $0x38] sm:$0xff] %v529_v19  ;;  %v420_v21 = vadd.f32 %v419_v20, %v1058_v10  ;;  %v532_v22 = vpop.f32.mrb[18].mxu1  ;;  %v421_v23 = vpop.f32.mrb[19].mxu0 }
 0x106   :  { %v533_v24 = vadd.f32 %v532_v22, %v1063_v13  ;;  %v422_v25 = vadd.f32 %v421_v23, %v1066_v14  ;;  %v534_v26 = vpop.f32.mrb[19].mxu1 }
 0x107   :  { %585 = vst [vmem:[%s1215_s3 + $0x60] sm:$0xff] %v420_v21  ;;  %v535_v27 = vadd.f32 %v534_v26, %v1073_v15 }
 0x108   :  { %587 = vst [vmem:[%s1215_s3 + $0x70] sm:$0xff] %v533_v24  ;;  %586 = vst [vmem:[%s1215_s3 + $0x68] sm:$0xff] %v422_v25  ;;  %v425_v28 = vpop.f32.mrb[20].mxu0 }
 0x109   :  { %588 = vst [vmem:[%s1215_s3 + $0x78] sm:$0xff] %v535_v27  ;;  %v426_v29 = vadd.f32 %v425_v28, %v1058_v10  ;;  %v538_v30 = vpop.f32.mrb[20].mxu1  ;;  %v427_v31 = vpop.f32.mrb[21].mxu0 }
 0x10a   :  { %v539_v32 = vadd.f32 %v538_v30, %v1063_v13  ;;  %v428_v33 = vadd.f32 %v427_v31, %v1066_v14  ;;  %v540_v34 = vpop.f32.mrb[21].mxu1 }
 0x10b   :  { %593 = vst [vmem:[%s1215_s3 + $0xa0] sm:$0xff] %v426_v29  ;;  %v541_v35 = vadd.f32 %v540_v34, %v1073_v15 }
 0x10c   :  { %595 = vst [vmem:[%s1215_s3 + $0xb0] sm:$0xff] %v539_v32  ;;  %594 = vst [vmem:[%s1215_s3 + $0xa8] sm:$0xff] %v428_v33  ;;  %v431_v36 = vpop.f32.mrb[22].mxu0 }
 0x10d   :  { %596 = vst [vmem:[%s1215_s3 + $0xb8] sm:$0xff] %v541_v35  ;;  %v432_v37 = vadd.f32 %v431_v36, %v1058_v10  ;;  %v544_v38 = vpop.f32.mrb[22].mxu1  ;;  %v433_v39 = vpop.f32.mrb[23].mxu0 }
 0x10e   :  { %v545_v40 = vadd.f32 %v544_v38, %v1063_v13  ;;  %v434_v41 = vadd.f32 %v433_v39, %v1066_v14  ;;  %v546_v42 = vpop.f32.mrb[23].mxu1 }
 0x10f   :  { %601 = vst [vmem:[%s1215_s3 + $0xe0] sm:$0xff] %v432_v37  ;;  %v547_v43 = vadd.f32 %v546_v42, %v1073_v15 }
 0x110   :  { %603 = vst [vmem:[%s1215_s3 + $0xf0] sm:$0xff] %v545_v40  ;;  %602 = vst [vmem:[%s1215_s3 + $0xe8] sm:$0xff] %v434_v41  ;;  %v437_v44 = vpop.f32.mrb[24].mxu0 }
 0x111   :  { %604 = vst [vmem:[%s1215_s3 + $0xf8] sm:$0xff] %v547_v43  ;;  %v438_v45 = vadd.f32 %v437_v44, %v1058_v10  ;;  %v550_v46 = vpop.f32.mrb[24].mxu1  ;;  %v439_v47 = vpop.f32.mrb[25].mxu0 }
 0x112   :  { %v551_v48 = vadd.f32 %v550_v46, %v1063_v13  ;;  %v440_v49 = vadd.f32 %v439_v47, %v1066_v14  ;;  %v552_v50 = vpop.f32.mrb[25].mxu1 }
 0x113   :  { %609 = vst [vmem:[%s1215_s3 + $0x120] sm:$0xff] %v438_v45  ;;  %v553_v51 = vadd.f32 %v552_v50, %v1073_v15 }
 0x114   :  { %611 = vst [vmem:[%s1215_s3 + $0x130] sm:$0xff] %v551_v48  ;;  %610 = vst [vmem:[%s1215_s3 + $0x128] sm:$0xff] %v440_v49  ;;  %v443_v52 = vpop.f32.mrb[26].mxu0 }
 0x115   :  { %612 = vst [vmem:[%s1215_s3 + $0x138] sm:$0xff] %v553_v51  ;;  %v444_v53 = vadd.f32 %v443_v52, %v1058_v10  ;;  %v556_v54 = vpop.f32.mrb[26].mxu1  ;;  %v445_v55 = vpop.f32.mrb[27].mxu0 }
 0x116   :  { %v557_v56 = vadd.f32 %v556_v54, %v1063_v13  ;;  %v446_v57 = vadd.f32 %v445_v55, %v1066_v14  ;;  %v558_v59 = vpop.f32.mrb[27].mxu1 }
 0x117   :  { %617 = vst [vmem:[%s1215_s3 + $0x160] sm:$0xff] %v444_v53  ;;  %v559_v61 = vadd.f32 %v558_v59, %v1073_v15 }
 0x118   :  { %619 = vst [vmem:[%s1215_s3 + $0x170] sm:$0xff] %v557_v56  ;;  %618 = vst [vmem:[%s1215_s3 + $0x168] sm:$0xff] %v446_v57  ;;  %v449_v62 = vpop.f32.mrb[28].mxu0 }
 0x119   :  { %620 = vst [vmem:[%s1215_s3 + $0x178] sm:$0xff] %v559_v61  ;;  %v450_v63 = vadd.f32 %v449_v62, %v1058_v10  ;;  %v562_v4 = vpop.f32.mrb[28].mxu1  ;;  %v451_v5 = vpop.f32.mrb[29].mxu0 }
 0x11a   :  { %v563_v6 = vadd.f32 %v562_v4, %v1063_v13  ;;  %v452_v7 = vadd.f32 %v451_v5, %v1066_v14  ;;  %v564_v8 = vpop.f32.mrb[29].mxu1 }
 0x11b   :  { %625 = vst [vmem:[%s1215_s3 + $0x1a0] sm:$0xff] %v450_v63  ;;  %v565_v9 = vadd.f32 %v564_v8, %v1073_v15 }
 0x11c   :  { %627 = vst [vmem:[%s1215_s3 + $0x1b0] sm:$0xff] %v563_v6  ;;  %626 = vst [vmem:[%s1215_s3 + $0x1a8] sm:$0xff] %v452_v7  ;;  %v455_v58 = vpop.f32.mrb[30].mxu0 }
 0x11d   :  { %628 = vst [vmem:[%s1215_s3 + $0x1b8] sm:$0xff] %v565_v9  ;;  %v456_v11 = vadd.f32 %v455_v58, %v1058_v10  ;;  %v568_v12 = vpop.f32.mrb[30].mxu1  ;;  %v457_v0 = vpop.f32.mrb[31].mxu0 }
 0x11e   :  { %v569_v1 = vadd.f32 %v568_v12, %v1063_v13  ;;  %v458_v2 = vadd.f32 %v457_v0, %v1066_v14  ;;  %v570_v16 = vpop.f32.mrb[31].mxu1 }
 0x11f   :  { %633 = vst [vmem:[%s1215_s3 + $0x1e0] sm:$0xff] %v456_v11  ;;  %v571_v3 = vadd.f32 %v570_v16, %v1073_v15 }
 0x120   :  { %635 = vst [vmem:[%s1215_s3 + $0x1f0] sm:$0xff] %v569_v1  ;;  %634 = vst [vmem:[%s1215_s3 + $0x1e8] sm:$0xff] %v458_v2 }
 0x121   :  { %636 = vst [vmem:[%s1215_s3 + $0x1f8] sm:$0xff] %v571_v3 }

// kernel: bilstm_crf_forward.4
= control target key start
LH: loop header
LB: loop body
LE: loop exit
PB: predicated region body
PF: predicated region fallthrough
CT: control target
= control target key end

     0   :  { %s1328_s15 = smov 0   ;;  %s1330_s16 = smov 0   ;;  %s1778_s0 = inlined_call_operand.vmem [shape: f32[8,8,1024], index: 0, kind: input, shape index: {}]   ;;  %s1779_s1 = inlined_call_operand.vmem [shape: f32[2,128,512], index: 1, kind: input, shape index: {}]   ;;  %s1780_s2 = inlined_call_operand.vmem [shape: f32[2,128,128], index: 2, kind: input, shape index: {}]   ;;  %s1781_s3 = inlined_call_operand.vmem [shape: f32[1,128], index: 3, kind: input, shape index: {}]   ;;  %s1782_s4 = inlined_call_operand.vmem [shape: f32[2,8,8,128], index: 4, kind: output, shape index: {}]  }
   0x1   :  { %s1332_s17 = smov 0   ;;  %s1334_s18 = smov 0  }
   0x2   :  { %s1336_s19 = smov 0  }
   0x3 LB: > { %s29_s20 = sadd.s32 1, %s1291_s18  ;;  %p59_p1 = scmp.ne.s32.totalorder %s1283_s16, %s1279_s15  ;;  %s1295_s19 = sphi %s1336_s19, %s14_s19   ;;  %s1291_s18 = sphi %s1334_s18, %s1826_s18   ;;  %s1287_s17 = sphi %s1332_s17, %s1825_s17   ;;  %s1283_s16 = sphi %s1330_s16, %s1824_s16   ;;  %s1279_s15 = sphi %s1328_s15, %s1823_s15  }
   0x4   : > { %p31_p0 = scmp.ge.s32.totalorder %s29_s20, 2  ;;  %p60_p2 = scmp.eq.s32.totalorder %s1295_s19, 0 }
   0x5   : > { %s52_s22 = sadd.s32 1, %s1283_s16  ;;  %p983_p5 = scmp.ge.s32.totalorder %s1295_s19, 2 }
   0x6   : > { %s1828_s20 = smov (%p31_p0, %s29_s20), 0  ;;  %p61_p3 = por %p60_p2, %p59_p1 }
   0x7   : > { %s48_s21 = ssub.s32 %s1291_s18, %s1828_s20  ;;  %199 = sbr.rel (%p983_p5) target bundleno = 34 (0x22), region = 20 }
   0x8   : > { %p50_p4 = scmp.eq.s32.totalorder %s48_s21, 0 }
   0xa   : > { %s1363_s23 = scalar_select %p50_p4, %s1283_s16, %s52_s22  }
   0xe   : > { %202 = sbr.rel (!%p61_p3) target bundleno = 34 (0x22), region = 24  ;;  %s204_s24 = sand.u32 (%p61_p3), 1, %s1283_s16  }
   0xf   : > { %s1008_s25 = sshll.u32 (%p61_p3), %s1291_s18, 5  ;;  %s984_s26 = sshll.u32 (%p61_p3), %s204_s24, 8 }
  0x10   : > { %s1371_s29 = scalar_lea.vmem (%p61_p3), %s1778_s0, %s1008_s25  ;;  %s1376_s30 = scalar_lea.vmem (%p61_p3), [#allocation5], %s984_s26 }
  0x11   : > { %v231_v0 = vld [vmem:[%s1371_s29] sm:$0xff] (%p61_p3)  ;;  %v233_v1 = vld [vmem:[%s1371_s29 + $0x8] sm:$0xff] (%p61_p3)  ;;  %v235_v2 = vld [vmem:[%s1371_s29 + $0x10] sm:$0xff] (%p61_p3) }
  0x12   : > { %232 = vst [vmem:[%s1376_s30] sm:$0xff] (%p61_p3), %v231_v0  ;;  %234 = vst [vmem:[%s1376_s30 + $0x8] sm:$0xff] (%p61_p3), %v233_v1  ;;  %v237_v3 = vld [vmem:[%s1371_s29 + $0x18] sm:$0xff] (%p61_p3)  ;;  %v239_v4 = vld [vmem:[%s1371_s29 + $0x40] sm:$0xff] (%p61_p3) }
  0x13   : > { %236 = vst [vmem:[%s1376_s30 + $0x10] sm:$0xff] (%p61_p3), %v235_v2  ;;  %v241_v5 = vld [vmem:[%s1371_s29 + $0x48] sm:$0xff] (%p61_p3)  ;;  %238 = vst [vmem:[%s1376_s30 + $0x18] sm:$0xff] (%p61_p3), %v237_v3  ;;  %v243_v6 = vld [vmem:[%s1371_s29 + $0x50] sm:$0xff] (%p61_p3) }
  0x14   : > { %240 = vst [vmem:[%s1376_s30 + $0x20] sm:$0xff] (%p61_p3), %v239_v4  ;;  %242 = vst [vmem:[%s1376_s30 + $0x28] sm:$0xff] (%p61_p3), %v241_v5  ;;  %v245_v7 = vld [vmem:[%s1371_s29 + $0x58] sm:$0xff] (%p61_p3)  ;;  %v247_v8 = vld [vmem:[%s1371_s29 + $0x80] sm:$0xff] (%p61_p3) }
  0x15   : > { %244 = vst [vmem:[%s1376_s30 + $0x30] sm:$0xff] %v243_v6  ;;  %246 = vst [vmem:[%s1376_s30 + $0x38] sm:$0xff] %v245_v7  ;;  %v249_v9 = vld [vmem:[%s1371_s29 + $0x88] sm:$0xff]  ;;  %v251_v10 = vld [vmem:[%s1371_s29 + $0x90] sm:$0xff] }
  0x16   : > { %248 = vst [vmem:[%s1376_s30 + $0x40] sm:$0xff] %v247_v8  ;;  %v253_v11 = vld [vmem:[%s1371_s29 + $0x98] sm:$0xff]  ;;  %250 = vst [vmem:[%s1376_s30 + $0x48] sm:$0xff] %v249_v9  ;;  %v255_v12 = vld [vmem:[%s1371_s29 + $0xc0] sm:$0xff] }
  0x17   : > { %252 = vst [vmem:[%s1376_s30 + $0x50] sm:$0xff] %v251_v10  ;;  %254 = vst [vmem:[%s1376_s30 + $0x58] sm:$0xff] %v253_v11  ;;  %v257_v13 = vld [vmem:[%s1371_s29 + $0xc8] sm:$0xff]  ;;  %v259_v14 = vld [vmem:[%s1371_s29 + $0xd0] sm:$0xff] }
  0x18   : > { %256 = vst [vmem:[%s1376_s30 + $0x60] sm:$0xff] %v255_v12  ;;  %258 = vst [vmem:[%s1376_s30 + $0x68] sm:$0xff] %v257_v13  ;;  %v261_v15 = vld [vmem:[%s1371_s29 + $0xd8] sm:$0xff]  ;;  %v263_v16 = vld [vmem:[%s1371_s29 + $0x100] sm:$0xff] }
  0x19   : > { %260 = vst [vmem:[%s1376_s30 + $0x70] sm:$0xff] %v259_v14  ;;  %v265_v17 = vld [vmem:[%s1371_s29 + $0x108] sm:$0xff]  ;;  %262 = vst [vmem:[%s1376_s30 + $0x78] sm:$0xff] %v261_v15  ;;  %v267_v18 = vld [vmem:[%s1371_s29 + $0x110] sm:$0xff] }
  0x1a   : > { %264 = vst [vmem:[%s1376_s30 + $0x80] sm:$0xff] %v263_v16  ;;  %266 = vst [vmem:[%s1376_s30 + $0x88] sm:$0xff] %v265_v17  ;;  %v269_v19 = vld [vmem:[%s1371_s29 + $0x118] sm:$0xff]  ;;  %v271_v20 = vld [vmem:[%s1371_s29 + $0x140] sm:$0xff] }
  0x1b   : > { %268 = vst [vmem:[%s1376_s30 + $0x90] sm:$0xff] %v267_v18  ;;  %270 = vst [vmem:[%s1376_s30 + $0x98] sm:$0xff] %v269_v19  ;;  %v273_v21 = vld [vmem:[%s1371_s29 + $0x148] sm:$0xff]  ;;  %v275_v22 = vld [vmem:[%s1371_s29 + $0x150] sm:$0xff] }
  0x1c   : > { %272 = vst [vmem:[%s1376_s30 + $0xa0] sm:$0xff] %v271_v20  ;;  %v277_v23 = vld [vmem:[%s1371_s29 + $0x158] sm:$0xff]  ;;  %274 = vst [vmem:[%s1376_s30 + $0xa8] sm:$0xff] %v273_v21  ;;  %v279_v24 = vld [vmem:[%s1371_s29 + $0x180] sm:$0xff] }
  0x1d   : > { %276 = vst [vmem:[%s1376_s30 + $0xb0] sm:$0xff] %v275_v22  ;;  %278 = vst [vmem:[%s1376_s30 + $0xb8] sm:$0xff] %v277_v23  ;;  %v281_v25 = vld [vmem:[%s1371_s29 + $0x188] sm:$0xff]  ;;  %v283_v26 = vld [vmem:[%s1371_s29 + $0x190] sm:$0xff] }
  0x1e   : > { %280 = vst [vmem:[%s1376_s30 + $0xc0] sm:$0xff] %v279_v24  ;;  %282 = vst [vmem:[%s1376_s30 + $0xc8] sm:$0xff] %v281_v25  ;;  %v285_v27 = vld [vmem:[%s1371_s29 + $0x198] sm:$0xff]  ;;  %v287_v28 = vld [vmem:[%s1371_s29 + $0x1c0] sm:$0xff] }
  0x1f   : > { %284 = vst [vmem:[%s1376_s30 + $0xd0] sm:$0xff] %v283_v26  ;;  %v289_v29 = vld [vmem:[%s1371_s29 + $0x1c8] sm:$0xff]  ;;  %286 = vst [vmem:[%s1376_s30 + $0xd8] sm:$0xff] %v285_v27  ;;  %v291_v30 = vld [vmem:[%s1371_s29 + $0x1d0] sm:$0xff] }
  0x20   : > { %288 = vst [vmem:[%s1376_s30 + $0xe0] sm:$0xff] %v287_v28  ;;  %290 = vst [vmem:[%s1376_s30 + $0xe8] sm:$0xff] %v289_v29  ;;  %v293_v31 = vld [vmem:[%s1371_s29 + $0x1d8] sm:$0xff] }
  0x21   : > { %292 = vst [vmem:[%s1376_s30 + $0xf0] sm:$0xff] %v291_v30  ;;  %294 = vst [vmem:[%s1376_s30 + $0xf8] sm:$0xff] %v293_v31 }
  0x22 PF: > { %p987_p6 = scmp.ge.s32.totalorder %s1295_s19, 1  ;;  %p315_p7 = scmp.lt.s32.totalorder %s1295_s19, 3 }
  0x24   : > { %p316_p8 = pnand %p987_p6, %p315_p7 }
  0x26   : > { %319 = sbr.rel (%p316_p8) target bundleno = 595 (0x253), region = 55 }
  0x2d   : > { %s322_s5 = sand.u32 1, %s1279_s15   ;;  %p374_p9 = scmp.lt.s32.totalorder %s1287_s17, 1  ;;  %v1301_v32 = vmov 0.0  }
  0x2e   : > { %s1443_s6 = sshll.u32 %s322_s5, 8  ;;  %409 = vst [vmem:[#allocation2] sm:$0xff] %v1301_v32  ;;  %410 = vst [vmem:[#allocation3] sm:$0xff] %v1301_v32  ;;  %s1654_s27 = smov 0  }
  0x2f   : > { %s375_s7 = scalar_select %p374_p9, %s1287_s17, 1 }
  0x30   : > { %s324_s26 = scalar_lea.vmem [#allocation5], %s1443_s6 }
  0x31   : > { %s1009_s8 = sshll.u32 %s375_s7, 9  ;;  %s1010_s9 = sshll.u32 %s375_s7, 7 }
  0x32   : > { %s1449_s12 = scalar_lea.vmem %s1779_s1, %s1009_s8  ;;  %s1454_s15 = scalar_lea.vmem %s1780_s2, %s1010_s9 }
  0x33   : > { %s1011_s21 = sshll.u32 %s375_s7, 6  ;;  %v1457_v33 = vld [vmem:[%s1449_s12] sm:$0xff]  ;;  %v1460_v34 = vld [vmem:[%s1449_s12 + $0x8] sm:$0xff]  ;;  %v1463_v35 = vld [vmem:[%s1449_s12 + $0x10] sm:$0xff] }
  0x34   : > { %1783 = vst [vmem:[#allocation6_spill] sm:$0xff] %v1457_v33  ;;  %1784 = vst [vmem:[#allocation7_spill] sm:$0xff] %v1460_v34  ;;  %s1468_s25 = scalar_lea.vmem %s1782_s4, %s1011_s21  ;;  %v1471_v36 = vld [vmem:[%s1449_s12 + $0x18] sm:$0xff]  ;;  %v1474_v37 = vld [vmem:[%s1449_s12 + $0x20] sm:$0xff] }
  0x35   : > { %1785 = vst [vmem:[#allocation8_spill] sm:$0xff] %v1463_v35  ;;  %1786 = vst [vmem:[#allocation9_spill] sm:$0xff] %v1471_v36  ;;  %v1477_v38 = vld [vmem:[%s1449_s12 + $0x28] sm:$0xff]  ;;  %v1480_v39 = vld [vmem:[%s1449_s12 + $0x30] sm:$0xff] }
  0x36   : > { %v1483_v40 = vld [vmem:[%s1449_s12 + $0x38] sm:$0xff]  ;;  %v1486_v41 = vld [vmem:[%s1449_s12 + $0x40] sm:$0xff]  ;;  %v1489_v42 = vld [vmem:[%s1449_s12 + $0x48] sm:$0xff] }
  0x37   : > { %v1492_v43 = vld [vmem:[%s1449_s12 + $0x50] sm:$0xff]  ;;  %v1495_v44 = vld [vmem:[%s1449_s12 + $0x58] sm:$0xff]  ;;  %v1498_v45 = vld [vmem:[%s1449_s12 + $0x60] sm:$0xff] }
  0x38   : > { %v1501_v46 = vld [vmem:[%s1449_s12 + $0x68] sm:$0xff]  ;;  %v1504_v47 = vld [vmem:[%s1449_s12 + $0x70] sm:$0xff]  ;;  %v1507_v48 = vld [vmem:[%s1449_s12 + $0x78] sm:$0xff] }
  0x39   : > { %v1510_v49 = vld [vmem:[%s1449_s12 + $0x80] sm:$0xff]  ;;  %v1513_v50 = vld [vmem:[%s1449_s12 + $0x88] sm:$0xff]  ;;  %v1516_v51 = vld [vmem:[%s1449_s12 + $0x90] sm:$0xff] }
  0x3a   : > { %v1519_v52 = vld [vmem:[%s1449_s12 + $0x98] sm:$0xff]  ;;  %v1522_v53 = vld [vmem:[%s1449_s12 + $0xa0] sm:$0xff]  ;;  %v1525_v54 = vld [vmem:[%s1449_s12 + $0xa8] sm:$0xff] }
  0x3b   : > { %v1528_v55 = vld [vmem:[%s1449_s12 + $0xb0] sm:$0xff]  ;;  %v1531_v56 = vld [vmem:[%s1449_s12 + $0xb8] sm:$0xff]  ;;  %v1534_v57 = vld [vmem:[%s1449_s12 + $0xc0] sm:$0xff] }
  0x3c   : > { %v1537_v58 = vld [vmem:[%s1449_s12 + $0xc8] sm:$0xff]  ;;  %v1540_v59 = vld [vmem:[%s1449_s12 + $0xd0] sm:$0xff]  ;;  %v1543_v60 = vld [vmem:[%s1449_s12 + $0xd8] sm:$0xff] }
  0x3d   : > { %v1546_v61 = vld [vmem:[%s1449_s12 + $0xe0] sm:$0xff]  ;;  %v1549_v62 = vld [vmem:[%s1449_s12 + $0xe8] sm:$0xff]  ;;  %v1552_v63 = vld [vmem:[%s1449_s12 + $0xf0] sm:$0xff] }
  0x3e   : > { %v1555_v0 = vld [vmem:[%s1449_s12 + $0xf8] sm:$0xff]  ;;  %v1558_v1 = vld [vmem:[%s1449_s12 + $0x100] sm:$0xff]  ;;  %v1561_v2 = vld [vmem:[%s1449_s12 + $0x108] sm:$0xff] }
  0x3f   : > { %1787 = vst [vmem:[#allocation10_spill] sm:$0xff] %v1555_v0  ;;  %1788 = vst [vmem:[#allocation11_spill] sm:$0xff] %v1558_v1  ;;  %v1564_v3 = vld [vmem:[%s1449_s12 + $0x110] sm:$0xff]  ;;  %v1567_v4 = vld [vmem:[%s1449_s12 + $0x118] sm:$0xff] }
  0x40   : > { %1789 = vst [vmem:[#allocation12_spill] sm:$0xff] %v1561_v2  ;;  %1790 = vst [vmem:[#allocation13_spill] sm:$0xff] %v1564_v3  ;;  %v1570_v5 = vld [vmem:[%s1449_s12 + $0x120] sm:$0xff]  ;;  %v1573_v6 = vld [vmem:[%s1449_s12 + $0x128] sm:$0xff] }
  0x41   : > { %1791 = vst [vmem:[#allocation14_spill] sm:$0xff] %v1567_v4  ;;  %1792 = vst [vmem:[#allocation15_spill] sm:$0xff] %v1570_v5  ;;  %v1576_v7 = vld [vmem:[%s1449_s12 + $0x130] sm:$0xff]  ;;  %v1579_v8 = vld [vmem:[%s1449_s12 + $0x138] sm:$0xff] }
  0x42   : > { %1793 = vst [vmem:[#allocation16_spill] sm:$0xff] %v1573_v6  ;;  %1794 = vst [vmem:[#allocation17_spill] sm:$0xff] %v1576_v7  ;;  %v1582_v9 = vld [vmem:[%s1449_s12 + $0x140] sm:$0xff]  ;;  %v1585_v10 = vld [vmem:[%s1449_s12 + $0x148] sm:$0xff] }
  0x43   : > { %1795 = vst [vmem:[#allocation18_spill] sm:$0xff] %v1579_v8  ;;  %1796 = vst [vmem:[#allocation19_spill] sm:$0xff] %v1582_v9  ;;  %v1588_v11 = vld [vmem:[%s1449_s12 + $0x150] sm:$0xff]  ;;  %v1591_v12 = vld [vmem:[%s1449_s12 + $0x158] sm:$0xff] }
  0x44   : > { %v1594_v13 = vld [vmem:[%s1449_s12 + $0x160] sm:$0xff]  ;;  %v1597_v14 = vld [vmem:[%s1449_s12 + $0x168] sm:$0xff]  ;;  %v1600_v15 = vld [vmem:[%s1449_s12 + $0x170] sm:$0xff] }
  0x45   : > { %v1603_v16 = vld [vmem:[%s1449_s12 + $0x178] sm:$0xff]  ;;  %v1606_v17 = vld [vmem:[%s1449_s12 + $0x180] sm:$0xff]  ;;  %v1609_v18 = vld [vmem:[%s1449_s12 + $0x188] sm:$0xff] }
  0x46   : > { %v1612_v19 = vld [vmem:[%s1449_s12 + $0x190] sm:$0xff]  ;;  %v1615_v20 = vld [vmem:[%s1449_s12 + $0x198] sm:$0xff]  ;;  %v1618_v21 = vld [vmem:[%s1449_s12 + $0x1a0] sm:$0xff] }
  0x47   : > { %v1621_v22 = vld [vmem:[%s1449_s12 + $0x1a8] sm:$0xff]  ;;  %v1624_v23 = vld [vmem:[%s1449_s12 + $0x1b0] sm:$0xff]  ;;  %v1627_v24 = vld [vmem:[%s1449_s12 + $0x1b8] sm:$0xff] }
  0x48   : > { %v1630_v25 = vld [vmem:[%s1449_s12 + $0x1c0] sm:$0xff]  ;;  %v1633_v26 = vld [vmem:[%s1449_s12 + $0x1c8] sm:$0xff]  ;;  %v1636_v27 = vld [vmem:[%s1449_s12 + $0x1d0] sm:$0xff] }
  0x49   : > { %1797 = vst [vmem:[#allocation20_spill] sm:$0xff] %v1630_v25  ;;  %1798 = vst [vmem:[#allocation21_spill] sm:$0xff] %v1636_v27  ;;  %v1639_v28 = vld [vmem:[%s1449_s12 + $0x1d8] sm:$0xff]  ;;  %v1642_v29 = vld [vmem:[%s1449_s12 + $0x1e0] sm:$0xff] }
  0x4a   : > { %1799 = vst [vmem:[#allocation22_spill] sm:$0xff] %v1639_v28  ;;  %1800 = vst [vmem:[#allocation23_spill] sm:$0xff] %v1642_v29  ;;  %v1645_v30 = vld [vmem:[%s1449_s12 + $0x1e8] sm:$0xff]  ;;  %v1648_v31 = vld [vmem:[%s1449_s12 + $0x1f0] sm:$0xff] }
  0x4b   : > { %1801 = vst [vmem:[#allocation24_spill] sm:$0xff] %v1648_v31  ;;  %v1651_v32 = vld [vmem:[%s1449_s12 + $0x1f8] sm:$0xff] }
  0x4c   : > { %1802 = vst [vmem:[#allocation25_spill] sm:$0xff] %v1651_v32 }
  0x4d LB: >> { %v1803_v34 = vld [vmem:[#allocation7_spill] sm:$0xff]  ;;  %v1804_v33 = vld [vmem:[#allocation6_spill] sm:$0xff]  ;;  %v1085_v25 = vpack.c.bf16 %v1501_v46, %v1489_v42  ;;  %v1805_v36 = vld [vmem:[#allocation9_spill] sm:$0xff]  ;;  %v1117_v28 = vpack.c.bf16 %v1507_v48, %v1495_v44  ;;  %s995_s28 = sshll.u32 %s1299_s27, 1  ;;  %s1299_s27 = sphi %s1654_s27, %s480_s27  }
  0x4e   : >> { %v1081_v27 = vpack.c.bf16 %v1477_v38, %v1803_v34  ;;  %v1083_v29 = vpack.c.bf16 %v1474_v37, %v1804_v33  ;;  %v1113_v31 = vpack.c.bf16 %v1483_v40, %v1805_v36  ;;  %v1806_v35 = vld [vmem:[#allocation8_spill] sm:$0xff]  ;;  %v1087_v34 = vpack.c.bf16 %v1498_v45, %v1486_v41  ;;  %v1807_v0 = vld [vmem:[#allocation10_spill] sm:$0xff]  ;;  %v1812_v1 = vld [vmem:[#allocation11_spill] sm:$0xff]  ;;  %s482_s29 = ssub.s32 7, %s995_s28 }
  0x4f   : >> { %v1115_v32 = vpack.c.bf16 %v1480_v39, %v1806_v35  ;;  %v1089_v33 = vpack.c.bf16 %v1525_v54, %v1513_v50  ;;  %v1119_v36 = vpack.c.bf16 %v1504_v47, %v1492_v43  ;;  %v1302_v35 = vmov 0.0   ;;  %v1808_v2 = vld [vmem:[#allocation12_spill] sm:$0xff]  ;;  %v1810_v4 = vld [vmem:[#allocation14_spill] sm:$0xff]  ;;  %v1813_v5 = vld [vmem:[#allocation15_spill] sm:$0xff]  ;;  %s483_s30 = smul.u32 %s1287_s17, %s482_s29 }
  0x50   : >> { %1082 = vmatprep.subr.bf16.mxu0 %v1081_v27  ;;  %1114 = vmatprep.subr.bf16.mxu1 %v1113_v31  ;;  %v1121_v27 = vpack.c.bf16 %v1531_v56, %v1519_v52  ;;  %v1123_v31 = vpack.c.bf16 %v1528_v55, %v1516_v51  ;;  %v1809_v6 = vld [vmem:[#allocation16_spill] sm:$0xff]  ;;  %v1811_v8 = vld [vmem:[#allocation18_spill] sm:$0xff]  ;;  %v1814_v3 = vld [vmem:[#allocation13_spill] sm:$0xff] }
  0x51   : >> { %1084 = vmatpush1.bf16.msra.mxu0 %v1083_v29  ;;  %1116 = vmatpush1.bf16.msra.mxu1 %v1115_v32  ;;  %v1091_v29 = vpack.c.bf16 %v1522_v53, %v1510_v49  ;;  %v1129_v32 = vpack.c.bf16 %v1811_v8, %v1810_v4  ;;  %v1815_v7 = vld [vmem:[#allocation17_spill] sm:$0xff]  ;;  %v1816_v9 = vld [vmem:[#allocation19_spill] sm:$0xff]  ;;  %s1726_s5 = sadd.s32 %s1299_s27, %s483_s30  ;;  %s480_s27 = sadd.s32 1, %s1299_s27  }
  0x52   : >> { %1086 = vmatprep.subr.bf16.mxu0 %v1085_v25  ;;  %1118 = vmatprep.subr.bf16.mxu1 %v1117_v28  ;;  %v1093_v25 = vpack.c.bf16 %v1549_v62, %v1537_v58  ;;  %v1125_v28 = vpack.c.bf16 %v1807_v0, %v1543_v60  ;;  %v1820_v0 = vld [vmem:[#allocation23_spill] sm:$0xff]  ;;  %s1012_s7 = sshll.u32 %s1726_s5, 5  ;;  %s998_s9 = sshll.u32 %s1726_s5, 3 }
  0x53   : >> { %557 = vmatprep.mubr.f32.mxu0 %v1302_v35  ;;  %628 = vmatprep.mubr.f32.mxu1 %v1302_v35  ;;  %v1099_v35 = vpack.c.bf16 %v1813_v5, %v1812_v1  ;;  %s487_s8 = scalar_lea.vmem %s324_s26, %s1012_s7 [#allocation5]  ;;  %s661_s10 = scalar_lea.vmem [#allocation4], %s998_s9 }
  0x54   : >> { %p477_p10 = scmp.ge.s32.totalorder %s480_s27, 8  }
  0x55   : >> { %1088 = vmatpush1.bf16.msra.mxu0 %v1087_v34  ;;  %1120 = vmatpush1.bf16.msra.mxu1 %v1119_v36  ;;  %v1095_v34 = vpack.c.bf16 %v1546_v61, %v1534_v57  ;;  %v1127_v36 = vpack.c.bf16 %v1552_v63, %v1540_v59  ;;  %v677_v40 = vld [vmem:[%s1454_s15 + $0x30] sm:$0xff] (%p477_p10)  ;;  %v678_v41 = vld [vmem:[%s1454_s15 + $0x38] sm:$0xff] (%p477_p10)  ;;  %v679_v43 = vld [vmem:[%s1454_s15 + $0x40] sm:$0xff] (%p477_p10)  ;;  %p793_p11 = scmp.eq.s32.totalorder (%p477_p10), %s1287_s17, 0  ;;  %v799_v61 = vlaneseq (%p477_p10) }
  0x56   : >> { %1090 = vmatprep.subr.bf16.mxu0 %v1089_v33  ;;  %1122 = vmatprep.subr.bf16.mxu1 %v1121_v27  ;;  %v1097_v33 = vpack.c.bf16 %v1809_v6, %v1808_v2  ;;  %v1101_v27 = vpack.c.bf16 %v1597_v14, %v1585_v10  ;;  %v1157_v42 = vpack.c.bf16 (%p477_p10), %v678_v41, %v677_v40  ;;  %v680_v44 = vld [vmem:[%s1454_s15 + $0x48] sm:$0xff] (%p477_p10)  ;;  %v681_v46 = vld [vmem:[%s1454_s15 + $0x50] sm:$0xff] (%p477_p10)  ;;  %v682_v47 = vld [vmem:[%s1454_s15 + $0x58] sm:$0xff] (%p477_p10) }
  0x57   : > { %v1161_v45 = vpack.c.bf16 (%p477_p10), %v680_v44, %v679_v43  ;;  %v1165_v48 = vpack.c.bf16 (%p477_p10), %v682_v47, %v681_v46  ;;  %v683_v49 = vld [vmem:[%s1454_s15 + $0x60] sm:$0xff] (%p477_p10)  ;;  %v684_v50 = vld [vmem:[%s1454_s15 + $0x68] sm:$0xff] (%p477_p10)  ;;  %v685_v52 = vld [vmem:[%s1454_s15 + $0x70] sm:$0xff] (%p477_p10)  ;;  %v800_v62 = vshrl.u32 (%p477_p10), %v799_v61, 7 }
  0x58   : > { %v1169_v51 = vpack.c.bf16 (%p477_p10), %v684_v50, %v683_v49  ;;  %v686_v53 = vld [vmem:[%s1454_s15 + $0x78] sm:$0xff] (%p477_p10)  ;;  %v792_v63 = vld [vmem:[%s1781_s3] sm:$0x1] (%p477_p10) }
  0x59   : >> { %1092 = vmatpush1.bf16.msra.mxu0 %v1091_v29  ;;  %1124 = vmatpush1.bf16.msra.mxu1 %v1123_v31  ;;  %v1131_v29 = vpack.c.bf16 %v1815_v7, %v1814_v3  ;;  %v1103_v31 = vpack.c.bf16 %v1594_v13, %v1816_v9  ;;  %v492_v3 = vld [vmem:[#allocation2] sm:$0xff]  ;;  %v1173_v54 = vpack.c.bf16 (%p477_p10), %v686_v53, %v685_v52 }
  0x5a   : >> { %1094 = vmatprep.subr.bf16.mxu0 %v1093_v25  ;;  %1126 = vmatprep.subr.bf16.mxu1 %v1125_v28  ;;  %v1133_v25 = vpack.c.bf16 %v1603_v16, %v1591_v12  ;;  %v1105_v28 = vpack.c.bf16 %v1621_v22, %v1609_v18  ;;  %v801_v12 = vsub.s32 (%p477_p10), 0, %v800_v62 }
  0x5d   : >> { %1096 = vmatpush1.bf16.msra.mxu0 %v1095_v34  ;;  %1128 = vmatpush1.bf16.msra.mxu1 %v1127_v36  ;;  %v1135_v34 = vpack.c.bf16 %v1600_v15, %v1588_v11  ;;  %v1107_v36 = vpack.c.bf16 %v1618_v21, %v1606_v17 }
  0x5e   : >> { %1098 = vmatprep.subr.bf16.mxu0 %v1097_v33  ;;  %1130 = vmatprep.subr.bf16.mxu1 %v1129_v32  ;;  %v1137_v33 = vpack.c.bf16 %v1627_v24, %v1615_v20  ;;  %v1109_v32 = vpack.c.bf16 %v1645_v30, %v1633_v26 }
  0x61   : >> { %1100 = vmatpush1.bf16.msra.mxu0 %v1099_v35  ;;  %1132 = vmatpush1.bf16.msra.mxu1 %v1131_v29  ;;  %v1139_v35 = vpack.c.bf16 %v1624_v23, %v1612_v19  ;;  %v1818_v29 = vld [vmem:[#allocation25_spill] sm:$0xff] }
  0x62   : >> { %1102 = vmatprep.subr.bf16.mxu0 %v1101_v27  ;;  %1134 = vmatprep.subr.bf16.mxu1 %v1133_v25  ;;  %v1817_v27 = vld [vmem:[#allocation22_spill] sm:$0xff] }
  0x63   : >> { %v1141_v25 = vpack.c.bf16 %v1818_v29, %v1817_v27 }
  0x65   : >> { %1104 = vmatpush1.bf16.msra.mxu0 %v1103_v31  ;;  %1136 = vmatpush1.bf16.msra.mxu1 %v1135_v34  ;;  %v1819_v31 = vld [vmem:[#allocation20_spill] sm:$0xff] }
  0x66   : >> { %1106 = vmatprep.subr.bf16.mxu0 %v1105_v28  ;;  %1138 = vmatprep.subr.bf16.mxu1 %v1137_v33  ;;  %v1111_v1 = vpack.c.bf16 %v1820_v0, %v1819_v31  ;;  %v1821_v28 = vld [vmem:[#allocation21_spill] sm:$0xff]  ;;  %v1822_v34 = vld [vmem:[#allocation24_spill] sm:$0xff] }
  0x67   : >> { %v1143_v2 = vpack.c.bf16 %v1822_v34, %v1821_v28  ;;  %v488_v0 = vld [vmem:[%s487_s8] sm:$0xff]  ;;  %v489_v33 = vld [vmem:[%s487_s8 + $0x8] sm:$0xff]  ;;  %v491_v28 = vld [vmem:[%s487_s8 + $0x18] sm:$0xff] }
  0x69   : >> { %1108 = vmatpush1.bf16.msra.mxu0 %v1107_v36  ;;  %1140 = vmatpush1.bf16.msra.mxu1 %v1139_v35 }
  0x6a   : >> { %1110 = vmatprep.subr.bf16.mxu0 %v1109_v32  ;;  %1142 = vmatprep.subr.bf16.mxu1 %v1141_v25  ;;  %v490_v32 = vld [vmem:[%s487_s8 + $0x10] sm:$0xff] }
  0x6d   : >> { %1112 = vmatpush1.bf16.msra.mxu0 %v1111_v1  ;;  %1144 = vmatpush1.bf16.msra.mxu1 %v1143_v2 }
  0x70   : >> { %558 = vmatmul.mubr.f32.vlgmr.msra.gmra.mrb[0].mxu0 %v492_v3  ;;  %629 = vmatmul.mubr.f32.vlgmr.msra.gmra.mrb[0].mxu1 %v492_v3 }
 0x143   : >> { %v559_v36 = vpop.f32.mrb[0].mxu0  ;;  %v630_v1 = vpop.f32.mrb[0].mxu1 }
 0x144   : >> { %v635_v35 = vadd.f32 %v559_v36, %v488_v0  ;;  %v561_v27 = vpop.f32.mrb[1].mxu0  ;;  %v632_v2 = vpop.f32.mrb[1].mxu1  ;;  %v637_v3 = vadd.f32 %v630_v1, %v490_v32  ;;  %v652_v36 = vld [vmem:[#allocation3] sm:$0xff] }
 0x145   : >> { %v636_v29 = vadd.f32 %v561_v27, %v489_v33  ;;  %v638_v34 = vadd.f32 %v632_v2, %v491_v28  ;;  %v676_v28 = vld [vmem:[%s1454_s15 + $0x28] sm:$0xff] (%p477_p10) }
 0x146   : >> { %v639_v25 = vmul.f32 0.5, %v635_v35 }
 0x147   : >> { %v643_v31 = vmul.f32 0.5, %v636_v29  ;;  %v648_v4 = vmul.f32 0.5, %v638_v34 }
 0x148   : >> { %1243 = vtanh.f32 %v639_v25 }
 0x149   : >> { %1245 = vtanh.f32 %v643_v31  ;;  %v675_v31 = vld [vmem:[%s1454_s15 + $0x20] sm:$0xff] (%p477_p10) }
 0x14a   : >> { %1247 = vtanh.f32 %v637_v3  ;;  %v1153_v37 = vpack.c.bf16 (%p477_p10), %v676_v28, %v675_v31 }
 0x14b   : >> { %1249 = vtanh.f32 %v648_v4  ;;  %v671_v4 = vld [vmem:[%s1454_s15] sm:$0xff] (%p477_p10) }
 0x152   : >> { %v1244_v5 = vpop.eup %1243 }
 0x153   : >> { %v1246_v6 = vpop.eup %1245  ;;  %v641_v7 = vmul.f32 0.5, %v1244_v5  ;;  %v672_v5 = vld [vmem:[%s1454_s15 + $0x8] sm:$0xff] (%p477_p10) }
 0x154   : >> { %v1248_v8 = vpop.eup %1247  ;;  %v645_v9 = vmul.f32 0.5, %v1246_v6  ;;  %v673_v6 = vld [vmem:[%s1454_s15 + $0x10] sm:$0xff] (%p477_p10) }
 0x155   : >> { %v642_v0 = vadd.f32 0.5, %v641_v7  ;;  %v1250_v1 = vpop.eup %1249  ;;  %v1145_v7 = vpack.c.bf16 (%p477_p10), %v672_v5, %v671_v4 }
 0x156   : >> { %v646_v33 = vadd.f32 0.5, %v645_v9  ;;  %v650_v29 = vmul.f32 0.5, %v1250_v1 }
 0x157   : >> { %v654_v27 = vmul.f32 %v1248_v8, %v642_v0  ;;  %v674_v8 = vld [vmem:[%s1454_s15 + $0x18] sm:$0xff] (%p477_p10)  ;;  %1146 = vmatprep.subr.bf16.mxu0 (%p477_p10), %v1145_v7  ;;  %1177 = vmatprep.subr.bf16.mxu1 (%p477_p10), %v1145_v7 }
 0x158   : >> { %v653_v35 = vmul.f32 %v652_v36, %v646_v33  ;;  %v651_v2 = vadd.f32 0.5, %v650_v29  ;;  %v1149_v9 = vpack.c.bf16 (%p477_p10), %v674_v8, %v673_v6  ;;  %1148 = vmatpush3.bf16.msra.mxu0 (%p477_p10), %v1145_v7  ;;  %1185 = vmatpush3.bf16.msra.mxu1 (%p477_p10), %v1145_v7 }
 0x15a   : >> { %v655_v32 = vadd.f32 %v654_v27, %v653_v35  ;;  %1150 = vmatprep.subr.bf16.mxu0 (%p477_p10), %v1149_v9  ;;  %1178 = vmatprep.subr.bf16.mxu1 (%p477_p10), %v1149_v9 }
 0x15c   : >> { %1251 = vtanh.f32 %v655_v32  ;;  %658 = vst [vmem:[#allocation3] sm:$0xff] %v655_v32  ;;  %1152 = vmatpush3.bf16.msra.mxu0 (%p477_p10), %v1149_v9  ;;  %1186 = vmatpush3.bf16.msra.mxu1 (%p477_p10), %v1149_v9 }
 0x15d   : > { %1154 = vmatprep.subr.bf16.mxu0 (%p477_p10), %v1153_v37  ;;  %1179 = vmatprep.subr.bf16.mxu1 (%p477_p10), %v1153_v37 }
 0x160   : > { %1156 = vmatpush3.bf16.msra.mxu0 (%p477_p10), %v1153_v37  ;;  %1187 = vmatpush3.bf16.msra.mxu1 (%p477_p10), %v1153_v37 }
 0x161   : > { %1158 = vmatprep.subr.bf16.mxu0 (%p477_p10), %v1157_v42  ;;  %1180 = vmatprep.subr.bf16.mxu1 (%p477_p10), %v1157_v42 }
 0x163   : > { %479 = sbr.rel (!%p477_p10) target bundleno = 77 (0x4d), region = 120 }
 0x164   : > { %1160 = vmatpush3.bf16.msra.mxu0 (%p477_p10), %v1157_v42  ;;  %1188 = vmatpush3.bf16.msra.mxu1 (%p477_p10), %v1157_v42 }
 0x165   : > { %1162 = vmatprep.subr.bf16.mxu0 (%p477_p10), %v1161_v45  ;;  %1181 = vmatprep.subr.bf16.mxu1 (%p477_p10), %v1161_v45 }
 0x166   : >> { %v1252_v25 = vpop.eup %1251 }
 0x167   : >> { %v657_v3 = vmul.f32 %v1252_v25, %v651_v2 }
 0x168   : > { %1164 = vmatpush3.bf16.msra.mxu0 (%p477_p10), %v1161_v45  ;;  %1189 = vmatpush3.bf16.msra.mxu1 (%p477_p10), %v1161_v45 }
 0x169   : >> { %659 = vst [vmem:[#allocation2] sm:$0xff] %v657_v3  ;;  %662 = vst [vmem:[%s661_s10] sm:$0xff] %v657_v3  ;;  %1166 = vmatprep.subr.bf16.mxu0 (%p477_p10), %v1165_v48  ;;  %1182 = vmatprep.subr.bf16.mxu1 (%p477_p10), %v1165_v48 }
 0x16a   : > { %s794_s6 = scalar_select %p793_p11, 1, 0 }
 0x16c   : > { %1168 = vmatpush3.bf16.msra.mxu0 %v1165_v48  ;;  %1190 = vmatpush3.bf16.msra.mxu1 %v1165_v48  ;;  %s795_s11 = scvt.s32.f32 %s794_s6 }
 0x16d   : > { %1170 = vmatprep.subr.bf16.mxu0 %v1169_v51  ;;  %1183 = vmatprep.subr.bf16.mxu1 %v1169_v51 }
 0x16e   : > { %v796_v10 = vstv %s795_s11 }
 0x16f   : > { %v797_v11 = vmul.f32 %v796_v10, %v792_v63 }
 0x170   : > { %v663_v38 = vld [vmem:[#allocation4] sm:$0xff]  ;;  %1172 = vmatpush3.bf16.msra.mxu0 %v1169_v51  ;;  %1191 = vmatpush3.bf16.msra.mxu1 %v1169_v51  ;;  %v664_v55 = vld [vmem:[#allocation4 + $0x8] sm:$0xff]  ;;  %v665_v57 = vld [vmem:[#allocation4 + $0x10] sm:$0xff] }
 0x171   : > { %v667_v39 = vld [vmem:[#allocation4 + $0x20] sm:$0xff]  ;;  %1069 = vmatprep.mubr.f32.mxu0 %v663_v38  ;;  %1174 = vmatprep.subr.bf16.mxu0 %v1173_v54  ;;  %v668_v56 = vld [vmem:[#allocation4 + $0x28] sm:$0xff]  ;;  %v669_v58 = vld [vmem:[#allocation4 + $0x30] sm:$0xff]  ;;  %v802_v13 = vrot.slane %v797_v11, %v801_v12 }
 0x172   : > { %1075 = vmatprep.mubr.f32.mxu1 %v667_v39  ;;  %1184 = vmatprep.subr.bf16.mxu1 %v1173_v54  ;;  %v666_v59 = vld [vmem:[#allocation4 + $0x18] sm:$0xff] }
 0x173   : > { %v670_v60 = vld [vmem:[#allocation4 + $0x38] sm:$0xff] }
 0x174   : > { %1176 = vmatpush3.bf16.msra.mxu0 %v1173_v54  ;;  %1192 = vmatpush3.bf16.msra.mxu1 %v1173_v54 }
 0x177   : > { %1070 = vmatmul.mubr.f32.vlgmr.msra.gmra.mrb[0].mxu0 %v664_v55  ;;  %1076 = vmatmul.mubr.f32.vlgmr.msra.gmra.mrb[0].mxu1 %v668_v56 }
 0x178   : > { %1072 = vmatprep.mubr.f32.mxu0 %v665_v57  ;;  %1078 = vmatprep.mubr.f32.mxu1 %v669_v58 }
 0x17b   : > { %1073 = vmatmul.mubr.f32.gmra.mrb[2].mxu0 %v666_v59  ;;  %1079 = vmatmul.mubr.f32.gmra.mrb[2].mxu1 %v670_v60 }
 0x24a   : > { %v1071_v14 = vpop.f32.mrb[0].mxu0  ;;  %v1077_v15 = vpop.f32.mrb[0].mxu1 }
 0x24b   : > { %v806_v16 = vadd.f32 %v1071_v14, %v802_v13  ;;  %v818_v17 = vadd.f32 %v1077_v15, %v802_v13  ;;  %v753_v18 = vpop.f32.mrb[1].mxu0  ;;  %v773_v19 = vpop.f32.mrb[1].mxu1 }
 0x24c   : > { %v804_v20 = vadd.f32 %v802_v13, %v753_v18  ;;  %v815_v21 = vadd.f32 %v802_v13, %v773_v19 }
 0x24d   : > { %999 = vst [vmem:[%s1468_s25 + $0x8] sm:$0xff] %v806_v16  ;;  %1003 = vst [vmem:[%s1468_s25 + $0x28] sm:$0xff] %v818_v17 }
 0x24e   : > { %805 = vst [vmem:[%s1468_s25] sm:$0xff] %v804_v20  ;;  %1002 = vst [vmem:[%s1468_s25 + $0x20] sm:$0xff] %v815_v21  ;;  %v1074_v22 = vpop.f32.mrb[2].mxu0  ;;  %v1080_v23 = vpop.f32.mrb[2].mxu1 }
 0x24f   : > { %v812_v24 = vadd.f32 %v1074_v22, %v802_v13  ;;  %v824_v26 = vadd.f32 %v1080_v23, %v802_v13  ;;  %v763_v30 = vpop.f32.mrb[3].mxu0  ;;  %v783_v34 = vpop.f32.mrb[3].mxu1 }
 0x250   : > { %v809_v0 = vadd.f32 %v802_v13, %v763_v30  ;;  %v821_v36 = vadd.f32 %v802_v13, %v783_v34 }
 0x251   : > { %1001 = vst [vmem:[%s1468_s25 + $0x18] sm:$0xff] %v812_v24  ;;  %1005 = vst [vmem:[%s1468_s25 + $0x38] sm:$0xff] %v824_v26 }
 0x252   : > { %1000 = vst [vmem:[%s1468_s25 + $0x10] sm:$0xff] %v809_v0  ;;  %1004 = vst [vmem:[%s1468_s25 + $0x30] sm:$0xff] %v821_v36 }
 0x253 PF: > { %s14_s19 = sadd.s32 1, %s1295_s19   ;;  %s1823_s15 = smov %s1283_s16 }
 0x254   : > { %p11_p12 = scmp.ge.s32.totalorder %s14_s19, 4   ;;  %s1824_s16 = smov %s1363_s23 }
 0x255   : > { %s1825_s17 = smov %s1291_s18  ;;  %s1826_s18 = smov %s1828_s20 }
 0x256   :  { %13 = sbr.rel (!%p11_p12) target bundleno = 3 (0x3), region = 131 }

</bundles_post_ra>
